<compile_context>
chip_gen: v7x
topology: tpu7x:2x2x1
jax: 0.10.0
libtpu: 0.0.40
codegen_flags: <defaults>
</compile_context>

<pallas_src>
import functools

import jax
import jax.numpy as jnp
from jax.experimental import pallas as pl
from jax.experimental.pallas import tpu as pltpu

_EPS = 1e-8          # torch.cosine_similarity default eps
_H = 100             # logical hidden size
_HP = 128            # padded hidden size (lane-dense)
_NOUT = 10           # block output size
_NCLS = 3            # number of class vectors
_TB = 256            # per-grid-step batch tile (rows)


# ----------------------------------------------------------------------------
# Kernel (one batch tile of TB samples per grid step)
# ----------------------------------------------------------------------------
def _net_kernel(x_ref, w1_ref, b1_ref, w2_ref, b2_ref, w3_ref, b3_ref,
                clsn_ref, out_ref):
    # ---- Layer 1: fan-in == 1 -> broadcast multiply on the VPU (no MXU) ----
    x = x_ref[...]                                                       # (TB, 1)
    h1 = jnp.maximum(x * w1_ref[...] + b1_ref[...], 0.0)                 # (TB, 128)

    # ---- Layer 2: (TB,128) x (128,128) on the MXU ----
    h2 = jnp.dot(h1, w2_ref[...], preferred_element_type=jnp.float32) + b2_ref[...]
    h2 = jnp.maximum(h2, 0.0)                                            # (TB, 128)

    # ---- Layer 3 + Sigmoid ----
    h3 = jnp.dot(h2, w3_ref[...], preferred_element_type=jnp.float32) + b3_ref[...]
    y = pl.reciprocal(1.0 + jnp.exp(-h3), approx=True)                   # (TB, 10)

    # ---- Cosine similarity vs. pre-normalized class vectors ----
    # classes are pre-normalized on the host (||c|| >= eps always holds for
    # torch.rand class vectors), so only 1/max(||y||, eps) is needed here.
    dots = jnp.dot(y, clsn_ref[...], preferred_element_type=jnp.float32)  # (TB, 3)
    sumsq = jnp.sum(y * y, axis=-1, keepdims=True)                        # (TB, 1)
    inv_norm = jax.lax.rsqrt(jnp.maximum(sumsq, _EPS * _EPS))             # 1/max(||y||,eps)
    sim = dots * inv_norm                                                 # (TB, 3)

    # ---- Softmax over the 3 similarities (exact divide so rows sum to 1) ----
    m = jnp.max(sim, axis=-1, keepdims=True)
    e = jnp.exp(sim - m)
    out_ref[...] = e / jnp.sum(e, axis=-1, keepdims=True)                 # (TB, 3)


# ----------------------------------------------------------------------------
# pallas_call wrapper (grid over batch tiles; weights resident in VMEM)
# ----------------------------------------------------------------------------
@functools.partial(jax.jit, static_argnums=(2,))
def _pallas_forward(x2d, prepped, tb):
    n = x2d.shape[0]                       # static, multiple of tb
    const = lambda i: (0, 0)               # resident across the whole grid
    grid_spec = pltpu.PrefetchScalarGridSpec(
        num_scalar_prefetch=0,
        grid=(n // tb,),
        in_specs=[
            pl.BlockSpec((tb, 1), lambda i: (i, 0)),      # x tile (moves per step)
            pl.BlockSpec((1, _HP), const),                # w1 (1,128)
            pl.BlockSpec((1, _HP), const),                # b1
            pl.BlockSpec((_HP, _HP), const),              # w2 (128,128)
            pl.BlockSpec((1, _HP), const),                # b2
            pl.BlockSpec((_HP, _NOUT), const),            # w3 (128,10)
            pl.BlockSpec((1, _NOUT), const),              # b3
            pl.BlockSpec((_NOUT, _NCLS), const),          # normalized classes^T (10,3)
        ],
        out_specs=pl.BlockSpec((tb, _NCLS), lambda i: (i, 0)),
    )
    return pl.pallas_call(
        _net_kernel,
        out_shape=jax.ShapeDtypeStruct((n, _NCLS), jnp.float32),
        grid_spec=grid_spec,
        compiler_params=pltpu.CompilerParams(
            dimension_semantics=("parallel",)),           # shard batch axis (v7x 2 TCs)
    )(x2d, *prepped)


def net_forward_batched(x, prepped):
    """x: (N, 1) float32 -> (N, 3) softmax over class similarities, per sample."""
    x2d = jnp.asarray(x, jnp.float32).reshape(-1, 1)
    n = x2d.shape[0]
    if n <= _TB:
        tb, n_pad = n, n                   # single step; block == full array dims
    else:
        tb = _TB
        n_pad = ((n + _TB - 1) // _TB) * _TB
    if n_pad != n:
        x2d = jnp.pad(x2d, ((0, n_pad - n), (0, 0)))
    return _pallas_forward(x2d, prepped, tb)[:n]


def net_forward(x, prepped):
    """Single sample, matching Net.forward: x (1,) -> (3,)."""
    return net_forward_batched(jnp.asarray(x, jnp.float32).reshape(1, 1),
                               prepped).reshape(_NCLS)


# ----------------------------------------------------------------------------
# One-time parameter layout prep
# ----------------------------------------------------------------------------
def prepare_params(params, classes):
    """Pad hidden dim to 128, reshape biases to (1,N), pre-normalize + transpose
    the class vectors.  Padded lanes/rows are zero so results are unchanged."""
    w1, b1, w2, b2, w3, b3 = params
    f32 = jnp.float32
    w1p = jnp.zeros((1, _HP), f32).at[:, :_H].set(w1.astype(f32))
    b1p = jnp.zeros((1, _HP), f32).at[:, :_H].set(b1.astype(f32)[None, :])
    w2p = jnp.zeros((_HP, _HP), f32).at[:_H, :_H].set(w2.astype(f32))
    b2p = jnp.zeros((1, _HP), f32).at[:, :_H].set(b2.astype(f32)[None, :])
    w3p = jnp.zeros((_HP, _NOUT), f32).at[:_H, :].set(w3.astype(f32))
    b3p = b3.astype(f32).reshape(1, _NOUT)
    cls = classes.astype(f32)                                            # (3,10)
    cls_norm = jnp.maximum(jnp.linalg.norm(cls, axis=1, keepdims=True), _EPS)
    clsn_t = (cls / cls_norm).T                                          # (10,3)
    return (w1p, b1p, w2p, b2p, w3p, b3p, clsn_t)


# ----------------------------------------------------------------------------
# Reference + synthetic params
# ----------------------------------------------------------------------------
def net_reference(x, params, classes):
    """Pure-JAX reference matching PyTorch forward semantics for one sample."""
    w1, b1, w2, b2, w3, b3 = params
    h1 = jnp.maximum(x @ w1 + b1, 0.0)
    h2 = jnp.maximum(h1 @ w2 + b2, 0.0)
    y = jax.nn.sigmoid(h2 @ w3 + b3)                                     # (10,)
    yn = jnp.linalg.norm(y)
    cn = jnp.linalg.norm(classes, axis=1)                                # (3,)
    sims = (classes @ y) / jnp.maximum(yn * cn, _EPS)                    # (3,)
    return jax.nn.softmax(sims)


def init_params(key):
    """Deterministic synthetic parameters matching the nn.Linear shapes."""
    ks = jax.random.split(key, 9)

    def lin(kw, kb, fan_in, fan_out):
        bound = 1.0 / jnp.sqrt(fan_in)
        w = jax.random.uniform(kw, (fan_in, fan_out), jnp.float32, -bound, bound)
        b = jax.random.uniform(kb, (fan_out,), jnp.float32, -bound, bound)
        return w, b

    w1, b1 = lin(ks[0], ks[1], 1, 100)
    w2, b2 = lin(ks[2], ks[3], 100, 100)
    w3, b3 = lin(ks[4], ks[5], 100, 10)
    classes = jax.random.uniform(ks[6], (3, 10), jnp.float32)  # torch.rand(10) x3
    return (w1, b1, w2, b2, w3, b3), classes


if __name__ == "__main__":
    # TODO(synk): the debug print() calls inside the PyTorch forward are side
    # effects with no kernel equivalent and are intentionally omitted.
    key = jax.random.PRNGKey(0)
    pkey, xkey = jax.random.split(key)
    params, classes = init_params(pkey)
    prepped = prepare_params(params, classes)          # one-time layout prep

    # Batched driver: N independent 1-feature samples -> 2 grid steps of _TB rows.
    n = 512
    xb = jax.random.normal(xkey, (n, 1), jnp.float32)
    out_b = net_forward_batched(xb, prepped)           # (N, 3)
    jax.block_until_ready(out_b)

    ref_b = jax.vmap(lambda xi: net_reference(xi, params, classes))(xb)
    assert out_b.shape == (n, 3)
    assert bool(jnp.all(jnp.abs(jnp.sum(out_b, axis=-1) - 1.0) < 1e-3))
    assert jnp.allclose(out_b, ref_b, atol=5e-3, rtol=5e-3)

    # Single-sample path: the literal nn.Module forward semantics, x (1,) -> (3,).
    out1 = net_forward(xb[0], prepped)
    jax.block_until_ready(out1)
    assert out1.shape == (3,)
    assert jnp.allclose(out1, ref_b[0], atol=5e-3, rtol=5e-3)

    print("KERNEL_OK")
</pallas_src>

<mosaic_0001>
module attributes {stable_mosaic.version = 11 : i64} {
  func.func @_net_kernel(%arg0: i32, %arg1: memref<256x1xf32, #tpu.memory_space<vmem>>, %arg2: memref<1x128xf32, #tpu.memory_space<vmem>>, %arg3: memref<1x128xf32, #tpu.memory_space<vmem>>, %arg4: memref<128x128xf32, #tpu.memory_space<vmem>>, %arg5: memref<1x128xf32, #tpu.memory_space<vmem>>, %arg6: memref<128x10xf32, #tpu.memory_space<vmem>>, %arg7: memref<1x10xf32, #tpu.memory_space<vmem>>, %arg8: memref<10x3xf32, #tpu.memory_space<vmem>>, %arg9: memref<256x3xf32, #tpu.memory_space<vmem>>) attributes {dimension_semantics = [#tpu.dimension_semantics<parallel>], iteration_bounds = array<i64: 2>, scalar_prefetch = 0 : i64, scratch_operands = 0 : i64, tpu.core_type = #tpu.core_type<tc>, window_params = [{transform_indices = @transform_0, window_bounds = array<i64: 256, 1>}, {pipeline_mode = #tpu.pipeline_mode<synchronous>, transform_indices = @transform_1, window_bounds = array<i64: 1, 128>}, {pipeline_mode = #tpu.pipeline_mode<synchronous>, transform_indices = @transform_2, window_bounds = array<i64: 1, 128>}, {pipeline_mode = #tpu.pipeline_mode<synchronous>, transform_indices = @transform_3, window_bounds = array<i64: 128, 128>}, {pipeline_mode = #tpu.pipeline_mode<synchronous>, transform_indices = @transform_4, window_bounds = array<i64: 1, 128>}, {pipeline_mode = #tpu.pipeline_mode<synchronous>, transform_indices = @transform_5, window_bounds = array<i64: 128, 10>}, {pipeline_mode = #tpu.pipeline_mode<synchronous>, transform_indices = @transform_6, window_bounds = array<i64: 1, 10>}, {pipeline_mode = #tpu.pipeline_mode<synchronous>, transform_indices = @transform_7, window_bounds = array<i64: 10, 3>}, {transform_indices = @transform_8, window_bounds = array<i64: 256, 3>}]} {
    %c0 = arith.constant 0 : index
    %c0_0 = arith.constant 0 : index
    %0 = vector.load %arg1[%c0, %c0_0] : memref<256x1xf32, #tpu.memory_space<vmem>>, vector<256x1xf32>
    %c0_1 = arith.constant 0 : index
    %c0_2 = arith.constant 0 : index
    %1 = vector.load %arg2[%c0_1, %c0_2] : memref<1x128xf32, #tpu.memory_space<vmem>>, vector<1x128xf32>
    %2 = vector.broadcast %0 : vector<256x1xf32> to vector<256x128xf32>
    %3 = vector.broadcast %1 : vector<1x128xf32> to vector<256x128xf32>
    %4 = arith.mulf %2, %3 : vector<256x128xf32>
    %c0_3 = arith.constant 0 : index
    %c0_4 = arith.constant 0 : index
    %5 = vector.load %arg3[%c0_3, %c0_4] : memref<1x128xf32, #tpu.memory_space<vmem>>, vector<1x128xf32>
    %6 = vector.broadcast %5 : vector<1x128xf32> to vector<256x128xf32>
    %7 = arith.addf %4, %6 : vector<256x128xf32>
    %cst = arith.constant 0.000000e+00 : f32
    %8 = vector.broadcast %cst : f32 to vector<256x128xf32>
    %9 = arith.maximumf %7, %8 : vector<256x128xf32>
    %c0_5 = arith.constant 0 : index
    %c0_6 = arith.constant 0 : index
    %10 = vector.load %arg4[%c0_5, %c0_6] : memref<128x128xf32, #tpu.memory_space<vmem>>, vector<128x128xf32>
    %cst_7 = arith.constant dense<0.000000e+00> : vector<256x128xf32>
    %11 = tpu.matmul %9, %10, %cst_7 {dimension_numbers = #tpu.dot_dimension_numbers<[1], [0], [0], [1], [0, 0, 1, 1], [], []>} : vector<256x128xf32>, vector<128x128xf32>, vector<256x128xf32> -> vector<256x128xf32>
    %c0_8 = arith.constant 0 : index
    %c0_9 = arith.constant 0 : index
    %12 = vector.load %arg5[%c0_8, %c0_9] : memref<1x128xf32, #tpu.memory_space<vmem>>, vector<1x128xf32>
    %13 = vector.broadcast %12 : vector<1x128xf32> to vector<256x128xf32>
    %14 = arith.addf %11, %13 : vector<256x128xf32>
    %cst_10 = arith.constant 0.000000e+00 : f32
    %15 = vector.broadcast %cst_10 : f32 to vector<256x128xf32>
    %16 = arith.maximumf %14, %15 : vector<256x128xf32>
    %c0_11 = arith.constant 0 : index
    %c0_12 = arith.constant 0 : index
    %17 = vector.load %arg6[%c0_11, %c0_12] : memref<128x10xf32, #tpu.memory_space<vmem>>, vector<128x10xf32>
    %cst_13 = arith.constant dense<0.000000e+00> : vector<256x10xf32>
    %18 = tpu.matmul %16, %17, %cst_13 {dimension_numbers = #tpu.dot_dimension_numbers<[1], [0], [0], [1], [0, 0, 1, 1], [], []>} : vector<256x128xf32>, vector<128x10xf32>, vector<256x10xf32> -> vector<256x10xf32>
    %c0_14 = arith.constant 0 : index
    %c0_15 = arith.constant 0 : index
    %19 = vector.load %arg7[%c0_14, %c0_15] : memref<1x10xf32, #tpu.memory_space<vmem>>, vector<1x10xf32>
    %20 = vector.broadcast %19 : vector<1x10xf32> to vector<256x10xf32>
    %21 = arith.addf %18, %20 : vector<256x10xf32>
    %cst_16 = arith.constant 0.000000e+00 : f32
    %22 = vector.broadcast %cst_16 : f32 to vector<256x10xf32>
    %23 = arith.subf %22, %21 : vector<256x10xf32>
    %24 = math.exp %23 : vector<256x10xf32>
    %cst_17 = arith.constant 1.000000e+00 : f32
    %25 = vector.broadcast %cst_17 : f32 to vector<256x10xf32>
    %26 = arith.addf %25, %24 : vector<256x10xf32>
    %27 = tpu.reciprocal %26 {approx = true} : vector<256x10xf32> -> vector<256x10xf32>
    %c0_18 = arith.constant 0 : index
    %c0_19 = arith.constant 0 : index
    %28 = vector.load %arg8[%c0_18, %c0_19] : memref<10x3xf32, #tpu.memory_space<vmem>>, vector<10x3xf32>
    %cst_20 = arith.constant dense<0.000000e+00> : vector<256x3xf32>
    %29 = tpu.matmul %27, %28, %cst_20 {dimension_numbers = #tpu.dot_dimension_numbers<[1], [0], [0], [1], [0, 0, 1, 1], [], []>} : vector<256x10xf32>, vector<10x3xf32>, vector<256x3xf32> -> vector<256x3xf32>
    %30 = arith.mulf %27, %27 : vector<256x10xf32>
    %cst_21 = arith.constant dense<0.000000e+00> : vector<256xf32>
    %31 = vector.multi_reduction <add>, %30, %cst_21 [1] : vector<256x10xf32> to vector<256xf32>
    %32 = vector.shape_cast %31 : vector<256xf32> to vector<256x1xf32>
    %cst_22 = arith.constant 1.000000e-16 : f32
    %33 = vector.broadcast %cst_22 : f32 to vector<256x1xf32>
    %34 = arith.maximumf %32, %33 : vector<256x1xf32>
    %35 = math.rsqrt %34 : vector<256x1xf32>
    %36 = vector.broadcast %35 : vector<256x1xf32> to vector<256x3xf32>
    %37 = arith.mulf %29, %36 : vector<256x3xf32>
    %cst_23 = arith.constant dense<0xFF800000> : vector<256xf32>
    %38 = vector.multi_reduction <maximumf>, %37, %cst_23 [1] : vector<256x3xf32> to vector<256xf32>
    %39 = vector.shape_cast %38 : vector<256xf32> to vector<256x1xf32>
    %40 = vector.broadcast %39 : vector<256x1xf32> to vector<256x3xf32>
    %41 = arith.subf %37, %40 : vector<256x3xf32>
    %42 = math.exp %41 : vector<256x3xf32>
    %cst_24 = arith.constant dense<0.000000e+00> : vector<256xf32>
    %43 = vector.multi_reduction <add>, %42, %cst_24 [1] : vector<256x3xf32> to vector<256xf32>
    %44 = vector.shape_cast %43 : vector<256xf32> to vector<256x1xf32>
    %45 = vector.broadcast %44 : vector<256x1xf32> to vector<256x3xf32>
    %46 = arith.divf %42, %45 : vector<256x3xf32>
    %c0_25 = arith.constant 0 : index
    %c0_26 = arith.constant 0 : index
    %47 = vector.load %arg9[%c0_25, %c0_26] : memref<256x3xf32, #tpu.memory_space<vmem>>, vector<256x3xf32>
    tpu.vector_store %arg9[%c0_25, %c0_26], %46 {strides = array<i32>} : memref<256x3xf32, #tpu.memory_space<vmem>>, vector<256x3xf32>,
    return
  }
  func.func @transform_0(%arg0: i32) -> (i32, i32) {
    %c0_i32 = arith.constant 0 : i32
    %c0_i32_0 = arith.constant 0 : i32
    return %arg0, %c0_i32 : i32, i32
  }
  func.func @transform_1(%arg0: i32) -> (i32, i32) {
    %c0_i32 = arith.constant 0 : i32
    %c0_i32_0 = arith.constant 0 : i32
    %c0_i32_1 = arith.constant 0 : i32
    return %c0_i32, %c0_i32_0 : i32, i32
  }
  func.func @transform_2(%arg0: i32) -> (i32, i32) {
    %c0_i32 = arith.constant 0 : i32
    %c0_i32_0 = arith.constant 0 : i32
    %c0_i32_1 = arith.constant 0 : i32
    return %c0_i32, %c0_i32_0 : i32, i32
  }
  func.func @transform_3(%arg0: i32) -> (i32, i32) {
    %c0_i32 = arith.constant 0 : i32
    %c0_i32_0 = arith.constant 0 : i32
    %c0_i32_1 = arith.constant 0 : i32
    return %c0_i32, %c0_i32_0 : i32, i32
  }
  func.func @transform_4(%arg0: i32) -> (i32, i32) {
    %c0_i32 = arith.constant 0 : i32
    %c0_i32_0 = arith.constant 0 : i32
    %c0_i32_1 = arith.constant 0 : i32
    return %c0_i32, %c0_i32_0 : i32, i32
  }
  func.func @transform_5(%arg0: i32) -> (i32, i32) {
    %c0_i32 = arith.constant 0 : i32
    %c0_i32_0 = arith.constant 0 : i32
    %c0_i32_1 = arith.constant 0 : i32
    return %c0_i32, %c0_i32_0 : i32, i32
  }
  func.func @transform_6(%arg0: i32) -> (i32, i32) {
    %c0_i32 = arith.constant 0 : i32
    %c0_i32_0 = arith.constant 0 : i32
    %c0_i32_1 = arith.constant 0 : i32
    return %c0_i32, %c0_i32_0 : i32, i32
  }
  func.func @transform_7(%arg0: i32) -> (i32, i32) {
    %c0_i32 = arith.constant 0 : i32
    %c0_i32_0 = arith.constant 0 : i32
    %c0_i32_1 = arith.constant 0 : i32
    return %c0_i32, %c0_i32_0 : i32, i32
  }
  func.func @transform_8(%arg0: i32) -> (i32, i32) {
    %c0_i32 = arith.constant 0 : i32
    %c0_i32_0 = arith.constant 0 : i32
    return %arg0, %c0_i32 : i32, i32
  }
}

</mosaic_0001>

<bundles_post_ra>
// kernel: _pallas_forward.1
= control target key start
LH: loop header
LB: loop body
LE: loop exit
PB: predicated region body
PF: predicated region fallthrough
CT: control target
= control target key end

     0   :  { %s3155_s27 = smov 0   ;;  %s3941_s0 = inlined_call_operand.vmem [shape: f32[512,1], index: 0, kind: input, shape index: {}]   ;;  %s3942_s1 = inlined_call_operand.vmem [shape: f32[1,128], index: 1, kind: input, shape index: {}]   ;;  %s3943_s2 = inlined_call_operand.vmem [shape: f32[1,128], index: 2, kind: input, shape index: {}]   ;;  %s3944_s3 = inlined_call_operand.vmem [shape: f32[128,128], index: 3, kind: input, shape index: {}]   ;;  %s3945_s4 = inlined_call_operand.vmem [shape: f32[1,128], index: 4, kind: input, shape index: {}]   ;;  %s3946_s5 = inlined_call_operand.vmem [shape: f32[128,10], index: 5, kind: input, shape index: {}]   ;;  %s3947_s6 = inlined_call_operand.vmem [shape: f32[1,10], index: 6, kind: input, shape index: {}]   ;;  %s3948_s7 = inlined_call_operand.vmem [shape: f32[10,3], index: 7, kind: input, shape index: {}]   ;;  %s3949_s8 = inlined_call_operand.vmem [shape: f32[512,3], index: 8, kind: output, shape index: {}]  }
   0x1 LB: > { %s2292_s28 = sadd.s32 4294967295, %s3106_s27   ;;  %p2296_p0 = scmp.ge.s32.totalorder %s3106_s27, 1  ;;  %s3106_s27 = sphi %s3155_s27, %s18_s27  }
   0x2   : > { %p263_p1 = scmp.lt.s32.totalorder %s3106_s27, 3 }
   0x4   : > { %p264_p2 = pnand %p2296_p0, %p263_p1 }
   0x5   : > { %s2297_s29 = sshll.u32 (!%p264_p2), %s2292_s28, 5  ;;  %v611_v0 = vld [vmem:[%s3944_s3] sm:$0xff] (!%p264_p2)  ;;  %v612_v1 = vld [vmem:[%s3944_s3 + $0x8] sm:$0xff] (!%p264_p2)  ;;  %v613_v2 = vld [vmem:[%s3944_s3 + $0x10] sm:$0xff] (!%p264_p2)  ;;  %v3108_v3 = vmov (!%p264_p2), 0   ;;  %vm1398_vm0 = vcmask (!%p264_p2), 1041408  }
   0x6   : > { %267 = sbr.rel (%p264_p2) target bundleno = 1210 (0x4ba), region = 52  ;;  %2779 = vset.pattern.permute.xlu1 (!%p264_p2), %v3108_v3  ;;  %2778 = vset.pattern.permute.xlu0 (!%p264_p2), %v3108_v3  ;;  %p298_p3 = scmp.lt.s32.totalorder (!%p264_p2), %s2297_s29, 63  ;;  %v2682_v4 = vpack.c.bf16 (!%p264_p2), %v612_v1, %v611_v0  ;;  %v614_v5 = vld [vmem:[%s3944_s3 + $0x18] sm:$0xff] (!%p264_p2)  ;;  %v615_v7 = vld [vmem:[%s3944_s3 + $0x20] sm:$0xff] (!%p264_p2)  ;;  %v616_v8 = vld [vmem:[%s3944_s3 + $0x28] sm:$0xff] (!%p264_p2)  ;;  %vm3109_vm1 = vmmov (!%p264_p2), 1  }
   0x7   : > { %v2686_v6 = vpack.c.bf16 (!%p264_p2), %v614_v5, %v613_v2  ;;  %v2690_v9 = vpack.c.bf16 (!%p264_p2), %v616_v8, %v615_v7  ;;  %v617_v10 = vld [vmem:[%s3944_s3 + $0x30] sm:$0xff] (!%p264_p2)  ;;  %v618_v13 = vld [vmem:[%s3944_s3 + $0x38] sm:$0xff] (!%p264_p2)  ;;  %v619_v17 = vld [vmem:[%s3944_s3 + $0x40] sm:$0xff] (!%p264_p2)  ;;  %vm1301_vm3 = vcmask (!%p264_p2), 80896   ;;  %vm1851_vm4 = vcmask (!%p264_p2), 23552  }
   0x8   : > { %2683 = vmatprep.subr.bf16.mxu0 (!%p264_p2), %v2682_v4  ;;  %2752 = vmatprep.subr.bf16.mxu1 (!%p264_p2), %v2682_v4  ;;  %v2694_v16 = vpack.c.bf16 (!%p264_p2), %v618_v13, %v617_v10  ;;  %v620_v18 = vld [vmem:[%s3944_s3 + $0x48] sm:$0xff] (!%p264_p2)  ;;  %v621_v22 = vld [vmem:[%s3944_s3 + $0x50] sm:$0xff] (!%p264_p2)  ;;  %v622_v23 = vld [vmem:[%s3944_s3 + $0x58] sm:$0xff] (!%p264_p2) }
   0x9   : > { %2685 = vmatpush3.bf16.msra.mxu0 (!%p264_p2), %v2682_v4  ;;  %2760 = vmatpush3.bf16.msra.mxu1 (!%p264_p2), %v2682_v4  ;;  %v2698_v21 = vpack.c.bf16 (!%p264_p2), %v620_v18, %v619_v17  ;;  %v2702_v26 = vpack.c.bf16 (!%p264_p2), %v622_v23, %v621_v22  ;;  %v623_v27 = vld [vmem:[%s3944_s3 + $0x60] sm:$0xff] (!%p264_p2)  ;;  %v624_v28 = vld [vmem:[%s3944_s3 + $0x68] sm:$0xff] (!%p264_p2)  ;;  %v625_v32 = vld [vmem:[%s3944_s3 + $0x70] sm:$0xff] (!%p264_p2) }
   0xa   : > { %2687 = vmatprep.subr.bf16.mxu0 (!%p264_p2), %v2686_v6  ;;  %2753 = vmatprep.subr.bf16.mxu1 (!%p264_p2), %v2686_v6  ;;  %v2706_v31 = vpack.c.bf16 (!%p264_p2), %v624_v28, %v623_v27  ;;  %v626_v33 = vld [vmem:[%s3944_s3 + $0x78] sm:$0xff] (!%p264_p2)  ;;  %v891_v57 = vld [vmem:[%s3946_s5] sm:$0xff] (!%p264_p2)  ;;  %v892_v58 = vld [vmem:[%s3946_s5 + $0x8] sm:$0xff] (!%p264_p2) }
   0xb   : > { %v2710_v36 = vpack.c.bf16 (!%p264_p2), %v626_v33, %v625_v32  ;;  %v3259_v59 = vpack.c.bf16 (!%p264_p2), %v892_v58, %v891_v57  ;;  %v3265_v60 = vld [vmem:[%s3942_s1] ss:$0 sm:$0xff] (!%p264_p2)  ;;  %vm2747_vm2 = vmpackc.low (!%p264_p2), %vm1398_vm0, %vm3109_vm1 }
   0xc   : > { %v3270_v61 = vld [vmem:[%s3943_s2] ss:$0 sm:$0xff] (!%p264_p2) }
   0xd   : > { %s3951_s29 = smov (!%p298_p3, %s2297_s29), 63  ;;  %2689 = vmatpush3.bf16.msra.mxu0 %v2686_v6  ;;  %2761 = vmatpush3.bf16.msra.mxu1 %v2686_v6 }
   0xe   : > { %s2298_s20 = sshll.u32 %s3951_s29, 3  ;;  %2691 = vmatprep.subr.bf16.mxu0 %v2690_v9  ;;  %2754 = vmatprep.subr.bf16.mxu1 %v2690_v9 }
   0xf   : > { %s3189_s23 = scalar_lea.vmem %s3941_s0, %s2298_s20  ;;  %s3840_s13 = scalar_lea.vmem %s3949_s8, %s2298_s20 }
  0x10   : > { %v311_v11 = vld [vmem:[%s3189_s23 + $0x10] sm:$0xff]  ;;  %v309_v12 = vld [vmem:[%s3189_s23] sm:$0xff]  ;;  %v312_v14 = vld [vmem:[%s3189_s23 + $0x18] sm:$0xff] }
  0x11   : > { %354 = vperm.xlu1 %2779, %v311_v11   ;;  %344 = vperm.xlu0 %2778, %v309_v12   ;;  %v310_v15 = vld [vmem:[%s3189_s23 + $0x8] sm:$0xff]  ;;  %v313_v20 = vld [vmem:[%s3189_s23 + $0x20] sm:$0xff]  ;;  %v316_v24 = vld [vmem:[%s3189_s23 + $0x38] sm:$0xff] }
  0x12   : > { %v314_v19 = vld [vmem:[%s3189_s23 + $0x28] sm:$0xff]  ;;  %2693 = vmatpush3.bf16.msra.mxu0 %v2690_v9  ;;  %2762 = vmatpush3.bf16.msra.mxu1 %v2690_v9  ;;  %v315_v25 = vld [vmem:[%s3189_s23 + $0x30] sm:$0xff]  ;;  %v317_v30 = vld [vmem:[%s3189_s23 + $0x40] sm:$0xff] }
  0x13   : > { %2695 = vmatprep.subr.bf16.mxu0 %v2694_v16  ;;  %2755 = vmatprep.subr.bf16.mxu1 %v2694_v16  ;;  %v318_v29 = vld [vmem:[%s3189_s23 + $0x48] sm:$0xff]  ;;  %v320_v34 = vld [vmem:[%s3189_s23 + $0x58] sm:$0xff]  ;;  %v319_v35 = vld [vmem:[%s3189_s23 + $0x50] sm:$0xff] }
  0x14   : > { %v322_v37 = vld [vmem:[%s3189_s23 + $0x68] sm:$0xff]  ;;  %v321_v38 = vld [vmem:[%s3189_s23 + $0x60] sm:$0xff]  ;;  %v324_v39 = vld [vmem:[%s3189_s23 + $0x78] sm:$0xff] }
  0x15   : > { %359 = vperm.xlu1 %2779, %v312_v14   ;;  %349 = vperm.xlu0 %2778, %v310_v15   ;;  %v323_v40 = vld [vmem:[%s3189_s23 + $0x70] sm:$0xff]  ;;  %v326_v41 = vld [vmem:[%s3189_s23 + $0x88] sm:$0xff]  ;;  %v325_v42 = vld [vmem:[%s3189_s23 + $0x80] sm:$0xff] }
  0x16   : > { %2697 = vmatpush3.bf16.msra.mxu0 %v2694_v16  ;;  %2763 = vmatpush3.bf16.msra.mxu1 %v2694_v16  ;;  %v328_v43 = vld [vmem:[%s3189_s23 + $0x98] sm:$0xff]  ;;  %v327_v44 = vld [vmem:[%s3189_s23 + $0x90] sm:$0xff]  ;;  %v330_v45 = vld [vmem:[%s3189_s23 + $0xa8] sm:$0xff] }
  0x17   : > { %2699 = vmatprep.subr.bf16.mxu0 %v2698_v21  ;;  %2756 = vmatprep.subr.bf16.mxu1 %v2698_v21  ;;  %v329_v46 = vld [vmem:[%s3189_s23 + $0xa0] sm:$0xff]  ;;  %v332_v47 = vld [vmem:[%s3189_s23 + $0xb8] sm:$0xff]  ;;  %v331_v48 = vld [vmem:[%s3189_s23 + $0xb0] sm:$0xff] }
  0x18   : > { %v334_v49 = vld [vmem:[%s3189_s23 + $0xc8] sm:$0xff]  ;;  %v333_v50 = vld [vmem:[%s3189_s23 + $0xc0] sm:$0xff]  ;;  %v336_v51 = vld [vmem:[%s3189_s23 + $0xd8] sm:$0xff] }
  0x19   : > { %369 = vperm.xlu1 %2779, %v314_v19   ;;  %364 = vperm.xlu0 %2778, %v313_v20   ;;  %v335_v52 = vld [vmem:[%s3189_s23 + $0xd0] sm:$0xff]  ;;  %v338_v53 = vld [vmem:[%s3189_s23 + $0xe8] sm:$0xff]  ;;  %v337_v54 = vld [vmem:[%s3189_s23 + $0xe0] sm:$0xff] }
  0x1a   : > { %2701 = vmatpush3.bf16.msra.mxu0 %v2698_v21  ;;  %2764 = vmatpush3.bf16.msra.mxu1 %v2698_v21  ;;  %v340_v55 = vld [vmem:[%s3189_s23 + $0xf8] sm:$0xff]  ;;  %v339_v56 = vld [vmem:[%s3189_s23 + $0xf0] sm:$0xff] }
  0x1b   : > { %2703 = vmatprep.subr.bf16.mxu0 %v2702_v26  ;;  %2757 = vmatprep.subr.bf16.mxu1 %v2702_v26 }
  0x1d   : > { %379 = vperm.xlu1 %2779, %v316_v24   ;;  %374 = vperm.xlu0 %2778, %v315_v25  }
  0x1e   : > { %2705 = vmatpush3.bf16.msra.mxu0 %v2702_v26  ;;  %2765 = vmatpush3.bf16.msra.mxu1 %v2702_v26 }
  0x1f   : > { %2707 = vmatprep.subr.bf16.mxu0 %v2706_v31  ;;  %2758 = vmatprep.subr.bf16.mxu1 %v2706_v31 }
  0x21   : > { %389 = vperm.xlu1 %2779, %v318_v29   ;;  %384 = vperm.xlu0 %2778, %v317_v30  }
  0x22   : > { %2709 = vmatpush3.bf16.msra.mxu0 %v2706_v31  ;;  %2766 = vmatpush3.bf16.msra.mxu1 %v2706_v31 }
  0x23   : > { %2711 = vmatprep.subr.bf16.mxu0 %v2710_v36  ;;  %2759 = vmatprep.subr.bf16.mxu1 %v2710_v36 }
  0x25   : > { %399 = vperm.xlu1 %2779, %v320_v34   ;;  %394 = vperm.xlu0 %2778, %v319_v35  }
  0x26   : > { %2713 = vmatpush3.bf16.msra.mxu0 %v2710_v36  ;;  %2767 = vmatpush3.bf16.msra.mxu1 %v2710_v36 }
  0x27   : > { %2715 = vmatprep.subr.bf16.mxu1 %v3259_v59 }
  0x29   : > { %409 = vperm.xlu1 %2779, %v322_v37   ;;  %404 = vperm.xlu0 %2778, %v321_v38  }
  0x2d   : > { %419 = vperm.xlu1 %2779, %v324_v39   ;;  %414 = vperm.xlu0 %2778, %v323_v40  }
  0x31   : > { %429 = vperm.xlu1 %2779, %v326_v41   ;;  %424 = vperm.xlu0 %2778, %v325_v42  }
  0x35   : > { %439 = vperm.xlu1 %2779, %v328_v43   ;;  %434 = vperm.xlu0 %2778, %v327_v44  }
  0x39   : > { %449 = vperm.xlu1 %2779, %v330_v45   ;;  %444 = vperm.xlu0 %2778, %v329_v46  }
  0x3d   : > { %459 = vperm.xlu1 %2779, %v332_v47   ;;  %454 = vperm.xlu0 %2778, %v331_v48  }
  0x41   : > { %469 = vperm.xlu1 %2779, %v334_v49   ;;  %464 = vperm.xlu0 %2778, %v333_v50  }
  0x45   : > { %479 = vperm.xlu1 %2779, %v336_v51   ;;  %474 = vperm.xlu0 %2778, %v335_v52  }
  0x49   : > { %489 = vperm.xlu1 %2779, %v338_v53   ;;  %484 = vperm.xlu0 %2778, %v337_v54  }
  0x4d   : > { %499 = vperm.xlu1 %2779, %v340_v55   ;;  %494 = vperm.xlu0 %2778, %v339_v56  }
  0x90   : > { %v355_v62 = vpop.permute.xlu1 %354  ;;  %v345_v63 = vpop.permute.xlu0 %344 }
  0x91   : > { %v510_v0 = vmul.f32 %v3265_v60, %v355_v62  ;;  %v508_v1 = vmul.f32 %v3265_v60, %v345_v63 }
  0x93   : > { %v547_v2 = vadd.f32 %v3270_v61, %v508_v1  ;;  %v549_v3 = vadd.f32 %v3270_v61, %v510_v0 }
  0x94   : > { %v360_v4 = vpop.permute.xlu1 %359  ;;  %v350_v5 = vpop.permute.xlu0 %349 }
  0x95   : > { %v511_v6 = vmul.f32 %v3265_v60, %v360_v4  ;;  %v509_v7 = vmul.f32 %v3265_v60, %v350_v5  ;;  %v579_v8 = vmax.f32 %v547_v2, 0.0  ;;  %v581_v13 = vmax.f32 %v549_v3, 0.0 }
  0x97   : > { %v548_v9 = vadd.f32 %v3270_v61, %v509_v7  ;;  %2502 = vmatprep.mubr.f32.mxu0 %v579_v8  ;;  %v550_v10 = vadd.f32 %v3270_v61, %v511_v6  ;;  %v893_v6 = vld [vmem:[%s3946_s5 + $0x10] sm:$0xff]  ;;  %v894_v7 = vld [vmem:[%s3946_s5 + $0x18] sm:$0xff] }
  0x98   : > { %v370_v11 = vpop.permute.xlu1 %369  ;;  %v365_v12 = vpop.permute.xlu0 %364 }
  0x99   : > { %v513_v14 = vmul.f32 %v3265_v60, %v370_v11  ;;  %v512_v15 = vmul.f32 %v3265_v60, %v365_v12  ;;  %v580_v16 = vmax.f32 %v548_v9, 0.0  ;;  %v582_v20 = vmax.f32 %v550_v10, 0.0 }
  0x9b   : > { %v551_v17 = vadd.f32 %v3270_v61, %v512_v15  ;;  %2503 = vmatmul.mubr.f32.vlgmr.msra.gmra.mrb[0].mxu0 %v580_v16  ;;  %v552_v21 = vadd.f32 %v3270_v61, %v513_v14  ;;  %v2718_v15 = vpack.c.bf16 %v894_v7, %v893_v6 }
  0x9c   : > { %v380_v18 = vpop.permute.xlu1 %379  ;;  %2505 = vmatprep.mubr.f32.mxu0 %v581_v13  ;;  %v375_v19 = vpop.permute.xlu0 %374 }
  0x9d   : > { %v515_v22 = vmul.f32 %v3265_v60, %v380_v18  ;;  %v514_v23 = vmul.f32 %v3265_v60, %v375_v19  ;;  %v583_v24 = vmax.f32 %v551_v17, 0.0  ;;  %v584_v31 = vmax.f32 %v552_v21, 0.0  ;;  %v895_v18 = vld [vmem:[%s3946_s5 + $0x20] sm:$0xff]  ;;  %v896_v19 = vld [vmem:[%s3946_s5 + $0x28] sm:$0xff] }
  0x9f   : > { %v553_v25 = vadd.f32 %v3270_v61, %v514_v23  ;;  %2506 = vmatmul.mubr.f32.gmra.mrb[2].mxu0 %v582_v20  ;;  %v554_v26 = vadd.f32 %v3270_v61, %v515_v22 }
  0xa0   : > { %v390_v27 = vpop.permute.xlu1 %389  ;;  %2508 = vmatprep.mubr.f32.mxu0 %v583_v24  ;;  %v385_v28 = vpop.permute.xlu0 %384 }
  0xa1   : > { %v517_v29 = vmul.f32 %v3265_v60, %v390_v27  ;;  %v516_v30 = vmul.f32 %v3265_v60, %v385_v28  ;;  %v585_v32 = vmax.f32 %v553_v25, 0.0  ;;  %v586_v36 = vmax.f32 %v554_v26, 0.0 }
  0xa2   : > { %v2722_v26 = vpack.c.bf16 %v896_v19, %v895_v18 }
  0xa3   : > { %v555_v33 = vadd.f32 %v3270_v61, %v516_v30  ;;  %2509 = vmatmul.mubr.f32.gmra.mrb[4].mxu0 %v584_v31  ;;  %v556_v37 = vadd.f32 %v3270_v61, %v517_v29  ;;  %v897_v29 = vld [vmem:[%s3946_s5 + $0x30] sm:$0xff]  ;;  %v898_v30 = vld [vmem:[%s3946_s5 + $0x38] sm:$0xff] }
  0xa4   : > { %v400_v34 = vpop.permute.xlu1 %399  ;;  %2511 = vmatprep.mubr.f32.mxu0 %v585_v32  ;;  %v395_v35 = vpop.permute.xlu0 %394 }
  0xa5   : > { %v519_v38 = vmul.f32 %v3265_v60, %v400_v34  ;;  %v518_v39 = vmul.f32 %v3265_v60, %v395_v35  ;;  %v587_v40 = vmax.f32 %v555_v33, 0.0  ;;  %v588_v47 = vmax.f32 %v556_v37, 0.0 }
  0xa7   : > { %v557_v41 = vadd.f32 %v3270_v61, %v518_v39  ;;  %2512 = vmatmul.mubr.f32.gmra.mrb[6].mxu0 %v586_v36  ;;  %v558_v42 = vadd.f32 %v3270_v61, %v519_v38  ;;  %v2726_v36 = vpack.c.bf16 %v898_v30, %v897_v29  ;;  %v899_v39 = vld [vmem:[%s3946_s5 + $0x40] sm:$0xff] }
  0xa8   : > { %v410_v43 = vpop.permute.xlu1 %409  ;;  %2514 = vmatprep.mubr.f32.mxu0 %v587_v40  ;;  %v405_v44 = vpop.permute.xlu0 %404  ;;  %v900_v40 = vld [vmem:[%s3946_s5 + $0x48] sm:$0xff] }
  0xa9   : > { %v521_v45 = vmul.f32 %v3265_v60, %v410_v43  ;;  %v520_v46 = vmul.f32 %v3265_v60, %v405_v44  ;;  %v589_v48 = vmax.f32 %v557_v41, 0.0  ;;  %v590_v52 = vmax.f32 %v558_v42, 0.0 }
  0xab   : > { %v559_v49 = vadd.f32 %v3270_v61, %v520_v46  ;;  %2515 = vmatmul.mubr.f32.gmra.mrb[8].mxu0 %v588_v47  ;;  %v560_v53 = vadd.f32 %v3270_v61, %v521_v45  ;;  %v2730_v47 = vpack.c.bf16 %v900_v40, %v899_v39 }
  0xac   : > { %v420_v50 = vpop.permute.xlu1 %419  ;;  %2517 = vmatprep.mubr.f32.mxu0 %v589_v48  ;;  %v415_v51 = vpop.permute.xlu0 %414 }
  0xad   : > { %v523_v54 = vmul.f32 %v3265_v60, %v420_v50  ;;  %v522_v55 = vmul.f32 %v3265_v60, %v415_v51  ;;  %v591_v56 = vmax.f32 %v559_v49, 0.0  ;;  %v592_v2 = vmax.f32 %v560_v53, 0.0  ;;  %v901_v50 = vld [vmem:[%s3946_s5 + $0x50] sm:$0xff]  ;;  %v902_v51 = vld [vmem:[%s3946_s5 + $0x58] sm:$0xff] }
  0xaf   : > { %v561_v57 = vadd.f32 %v3270_v61, %v522_v55  ;;  %2518 = vmatmul.mubr.f32.gmra.mrb[10].mxu0 %v590_v52  ;;  %v562_v58 = vadd.f32 %v3270_v61, %v523_v54 }
  0xb0   : > { %v430_v62 = vpop.permute.xlu1 %429  ;;  %2520 = vmatprep.mubr.f32.mxu0 %v591_v56  ;;  %v425_v63 = vpop.permute.xlu0 %424 }
  0xb1   : > { %v525_v0 = vmul.f32 %v3265_v60, %v430_v62  ;;  %v524_v1 = vmul.f32 %v3265_v60, %v425_v63  ;;  %v593_v3 = vmax.f32 %v561_v57, 0.0  ;;  %v594_v10 = vmax.f32 %v562_v58, 0.0 }
  0xb2   : > { %v2734_v58 = vpack.c.bf16 %v902_v51, %v901_v50 }
  0xb3   : > { %v564_v4 = vadd.f32 %v3270_v61, %v525_v0  ;;  %2521 = vmatmul.mubr.f32.gmra.mrb[12].mxu0 %v592_v2  ;;  %v563_v5 = vadd.f32 %v3270_v61, %v524_v1  ;;  %v903_v0 = vld [vmem:[%s3946_s5 + $0x60] sm:$0xff]  ;;  %v904_v1 = vld [vmem:[%s3946_s5 + $0x68] sm:$0xff] }
  0xb4   : > { %v440_v8 = vpop.permute.xlu1 %439  ;;  %2523 = vmatprep.mubr.f32.mxu0 %v593_v3  ;;  %v435_v9 = vpop.permute.xlu0 %434 }
  0xb5   : > { %v527_v11 = vmul.f32 %v3265_v60, %v440_v8  ;;  %v526_v12 = vmul.f32 %v3265_v60, %v435_v9  ;;  %v595_v13 = vmax.f32 %v563_v5, 0.0  ;;  %v596_v14 = vmax.f32 %v564_v4, 0.0 }
  0xb6   : > { %v2738_v8 = vpack.c.bf16 %v904_v1, %v903_v0 }
  0xb7   : > { %v566_v16 = vadd.f32 %v3270_v61, %v527_v11  ;;  %v565_v17 = vadd.f32 %v3270_v61, %v526_v12  ;;  %2524 = vmatmul.mubr.f32.gmra.mrb[14].mxu0 %v594_v10  ;;  %2526 = vmatprep.mubr.f32.mxu1 %v595_v13 }
  0xb8   : > { %v450_v20 = vpop.permute.xlu1 %449  ;;  %2527 = vmatmul.mubr.f32.vlgmr.msra.gmra.mrb[0].mxu1 %v596_v14  ;;  %v445_v21 = vpop.permute.xlu0 %444 }
  0xb9   : > { %v529_v22 = vmul.f32 %v3265_v60, %v450_v20  ;;  %v528_v23 = vmul.f32 %v3265_v60, %v445_v21  ;;  %v597_v24 = vmax.f32 %v565_v17, 0.0  ;;  %v598_v25 = vmax.f32 %v566_v16, 0.0  ;;  %2717 = vmatpush3.bf16.msra.mxu1 %v3259_v59  ;;  %v905_v21 = vld [vmem:[%s3946_s5 + $0x70] sm:$0xff] }
  0xba   : > { %2719 = vmatprep.subr.bf16.mxu1 %v2718_v15 }
  0xbb   : > { %v568_v27 = vadd.f32 %v3270_v61, %v529_v22  ;;  %v567_v28 = vadd.f32 %v3270_v61, %v528_v23  ;;  %2529 = vmatprep.mubr.f32.mxu1 %v597_v24 }
  0xbc   : > { %v460_v31 = vpop.permute.xlu1 %459  ;;  %2530 = vmatmul.mubr.f32.gmra.mrb[2].mxu1 %v598_v25  ;;  %v455_v32 = vpop.permute.xlu0 %454 }
  0xbd   : > { %v531_v59 = vmul.f32 %v3265_v60, %v460_v31  ;;  %v530_v33 = vmul.f32 %v3265_v60, %v455_v32  ;;  %v599_v34 = vmax.f32 %v567_v28, 0.0  ;;  %v600_v35 = vmax.f32 %v568_v27, 0.0  ;;  %2721 = vmatpush3.bf16.msra.mxu1 %v2718_v15 }
  0xbe   : > { %2723 = vmatprep.subr.bf16.mxu1 %v2722_v26 }
  0xbf   : > { %v570_v37 = vadd.f32 %v3270_v61, %v531_v59  ;;  %v569_v38 = vadd.f32 %v3270_v61, %v530_v33  ;;  %2532 = vmatprep.mubr.f32.mxu1 %v599_v34 }
  0xc0   : > { %v470_v41 = vpop.permute.xlu1 %469  ;;  %2533 = vmatmul.mubr.f32.gmra.mrb[4].mxu1 %v600_v35  ;;  %v465_v42 = vpop.permute.xlu0 %464 }
  0xc1   : > { %v533_v43 = vmul.f32 %v3265_v60, %v470_v41  ;;  %v532_v44 = vmul.f32 %v3265_v60, %v465_v42  ;;  %v601_v45 = vmax.f32 %v569_v38, 0.0  ;;  %v602_v46 = vmax.f32 %v570_v37, 0.0  ;;  %2725 = vmatpush3.bf16.msra.mxu1 %v2722_v26 }
  0xc2   : > { %2727 = vmatprep.subr.bf16.mxu1 %v2726_v36 }
  0xc3   : > { %v572_v48 = vadd.f32 %v3270_v61, %v533_v43  ;;  %v571_v49 = vadd.f32 %v3270_v61, %v532_v44  ;;  %2535 = vmatprep.mubr.f32.mxu1 %v601_v45 }
  0xc4   : > { %v480_v52 = vpop.permute.xlu1 %479  ;;  %2536 = vmatmul.mubr.f32.gmra.mrb[6].mxu1 %v602_v46  ;;  %v475_v53 = vpop.permute.xlu0 %474 }
  0xc5   : > { %v535_v54 = vmul.f32 %v3265_v60, %v480_v52  ;;  %v534_v55 = vmul.f32 %v3265_v60, %v475_v53  ;;  %v603_v56 = vmax.f32 %v571_v49, 0.0  ;;  %v604_v57 = vmax.f32 %v572_v48, 0.0  ;;  %2729 = vmatpush3.bf16.msra.mxu1 %v2726_v36 }
  0xc6   : > { %2731 = vmatprep.subr.bf16.mxu1 %v2730_v47 }
  0xc7   : > { %v574_v62 = vadd.f32 %v3270_v61, %v535_v54  ;;  %v573_v63 = vadd.f32 %v3270_v61, %v534_v55  ;;  %2538 = vmatprep.mubr.f32.mxu1 %v603_v56 }
  0xc8   : > { %v490_v2 = vpop.permute.xlu1 %489  ;;  %2539 = vmatmul.mubr.f32.gmra.mrb[8].mxu1 %v604_v57  ;;  %v485_v3 = vpop.permute.xlu0 %484 }
  0xc9   : > { %v537_v4 = vmul.f32 %v3265_v60, %v490_v2  ;;  %v536_v5 = vmul.f32 %v3265_v60, %v485_v3  ;;  %v605_v6 = vmax.f32 %v573_v63, 0.0  ;;  %v606_v7 = vmax.f32 %v574_v62, 0.0  ;;  %2733 = vmatpush3.bf16.msra.mxu1 %v2730_v47 }
  0xca   : > { %2735 = vmatprep.subr.bf16.mxu1 %v2734_v58 }
  0xcb   : > { %v576_v9 = vadd.f32 %v3270_v61, %v537_v4  ;;  %v575_v10 = vadd.f32 %v3270_v61, %v536_v5  ;;  %2541 = vmatprep.mubr.f32.mxu1 %v605_v6 }
  0xcc   : > { %v500_v11 = vpop.permute.xlu1 %499  ;;  %2542 = vmatmul.mubr.f32.gmra.mrb[10].mxu1 %v606_v7  ;;  %v495_v12 = vpop.permute.xlu0 %494 }
  0xcd   : > { %v608_v13 = vmax.f32 %v576_v9, 0.0  ;;  %v539_v14 = vmul.f32 %v3265_v60, %v500_v11  ;;  %v538_v15 = vmul.f32 %v3265_v60, %v495_v12  ;;  %v607_v16 = vmax.f32 %v575_v10, 0.0  ;;  %2737 = vmatpush3.bf16.msra.mxu1 %v2734_v58  ;;  %v906_v60 = vld [vmem:[%s3946_s5 + $0x78] sm:$0xff] }
  0xce   : > { %2739 = vmatprep.subr.bf16.mxu1 %v2738_v8  ;;  %v2742_v22 = vpack.c.bf16 %v906_v60, %v905_v21 }
  0xcf   : > { %v578_v17 = vadd.f32 %v3270_v61, %v539_v14  ;;  %v577_v18 = vadd.f32 %v3270_v61, %v538_v15  ;;  %2544 = vmatprep.mubr.f32.mxu1 %v607_v16  ;;  %v3382_v61 = vld [vmem:[%s3945_s4] ss:$0 sm:$0xff] }
  0xd0   : > { %2545 = vmatmul.mubr.f32.gmra.mrb[12].mxu1 %v608_v13 }
  0xd1   : > { %v610_v19 = vmax.f32 %v578_v17, 0.0  ;;  %v609_v20 = vmax.f32 %v577_v18, 0.0  ;;  %2741 = vmatpush3.bf16.msra.mxu1 %v2738_v8 }
  0xd2   : > { %2743 = vmatprep.subr.bf16.mxu1 %v2742_v22 }
  0xd3   : > { %2547 = vmatprep.mubr.f32.mxu1 %v609_v20 }
  0xd4   : > { %2548 = vmatmul.mubr.f32.gmra.mrb[14].mxu1 %v610_v19 }
  0xd5   : > { %2745 = vmatpush3.bf16.msra.mxu1 %v2742_v22 }
 0x16e   : > { %v2504_v23 = vpop.f32.mrb[0].mxu0 }
 0x16f   : > { %v706_v24 = vadd.f32 %v2504_v23, %v3382_v61  ;;  %v700_v25 = vpop.f32.mrb[1].mxu0 }
 0x170   : > { %v701_v26 = vadd.f32 %v3382_v61, %v700_v25 }
 0x171   : > { %v860_v29 = vmax.f32 %v706_v24, 0.0 }
 0x172   : > { %v859_v27 = vmax.f32 %v701_v26, 0.0  ;;  %v2507_v28 = vpop.f32.mrb[2].mxu0 }
 0x173   : > { %v716_v30 = vadd.f32 %v2507_v28, %v3382_v61  ;;  %v710_v31 = vpop.f32.mrb[3].mxu0 }
 0x174   : > { %v711_v32 = vadd.f32 %v3382_v61, %v710_v31  ;;  %2582 = vmatprep.mubr.f32.mxu1 %v859_v27 }
 0x175   : > { %2583 = vmatmul.mubr.f32.vlgmr.msra.gmra.mrb[16].mxu1 %v860_v29  ;;  %v862_v34 = vmax.f32 %v716_v30, 0.0 }
 0x176   : > { %v861_v59 = vmax.f32 %v711_v32, 0.0  ;;  %v2510_v33 = vpop.f32.mrb[4].mxu0 }
 0x177   : > { %v726_v35 = vadd.f32 %v2510_v33, %v3382_v61  ;;  %v720_v36 = vpop.f32.mrb[5].mxu0 }
 0x178   : > { %v721_v37 = vadd.f32 %v3382_v61, %v720_v36  ;;  %2585 = vmatprep.mubr.f32.mxu1 %v861_v59 }
 0x179   : > { %2586 = vmatmul.mubr.f32.gmra.mrb[18].mxu1 %v862_v34  ;;  %v864_v40 = vmax.f32 %v726_v35, 0.0 }
 0x17a   : > { %v863_v38 = vmax.f32 %v721_v37, 0.0  ;;  %v2513_v39 = vpop.f32.mrb[6].mxu0 }
 0x17b   : > { %v736_v41 = vadd.f32 %v2513_v39, %v3382_v61  ;;  %v730_v42 = vpop.f32.mrb[7].mxu0 }
 0x17c   : > { %v731_v43 = vadd.f32 %v3382_v61, %v730_v42  ;;  %2588 = vmatprep.mubr.f32.mxu1 %v863_v38 }
 0x17d   : > { %2589 = vmatmul.mubr.f32.gmra.mrb[20].mxu1 %v864_v40  ;;  %v866_v46 = vmax.f32 %v736_v41, 0.0 }
 0x17e   : > { %v865_v44 = vmax.f32 %v731_v43, 0.0  ;;  %v2516_v45 = vpop.f32.mrb[8].mxu0 }
 0x17f   : > { %v746_v47 = vadd.f32 %v2516_v45, %v3382_v61  ;;  %v740_v48 = vpop.f32.mrb[9].mxu0 }
 0x180   : > { %v741_v49 = vadd.f32 %v3382_v61, %v740_v48  ;;  %2591 = vmatprep.mubr.f32.mxu1 %v865_v44 }
 0x181   : > { %2592 = vmatmul.mubr.f32.gmra.mrb[22].mxu1 %v866_v46  ;;  %v868_v52 = vmax.f32 %v746_v47, 0.0 }
 0x182   : > { %v867_v50 = vmax.f32 %v741_v49, 0.0  ;;  %v2519_v51 = vpop.f32.mrb[10].mxu0 }
 0x183   : > { %v756_v53 = vadd.f32 %v2519_v51, %v3382_v61  ;;  %v750_v54 = vpop.f32.mrb[11].mxu0 }
 0x184   : > { %v751_v55 = vadd.f32 %v3382_v61, %v750_v54  ;;  %2594 = vmatprep.mubr.f32.mxu1 %v867_v50 }
 0x185   : > { %2595 = vmatmul.mubr.f32.gmra.mrb[24].mxu1 %v868_v52  ;;  %v870_v58 = vmax.f32 %v756_v53, 0.0 }
 0x186   : > { %v869_v56 = vmax.f32 %v751_v55, 0.0  ;;  %v2522_v57 = vpop.f32.mrb[12].mxu0  ;;  %v1299_v55 = vld [vmem:[%s3948_s7] sm:$0xff] }
 0x187   : > { %v766_v62 = vadd.f32 %v2522_v57, %v3382_v61  ;;  %v760_v63 = vpop.f32.mrb[13].mxu0 }
 0x188   : > { %v761_v0 = vadd.f32 %v3382_v61, %v760_v63  ;;  %2597 = vmatprep.mubr.f32.mxu1 %v869_v56  ;;  %v1300_v56 = vld [vmem:[%s3948_s7 + $0x8] sm:$0x3] }
 0x189   : > { %2598 = vmatmul.mubr.f32.gmra.mrb[26].mxu1 %v870_v58  ;;  %v872_v3 = vmax.f32 %v766_v62, 0.0  ;;  %v2746_v57 = vpack.c.bf16 %v1300_v56, %v1299_v55 }
 0x18a   : > { %v871_v1 = vmax.f32 %v761_v0, 0.0  ;;  %v2525_v2 = vpop.f32.mrb[14].mxu0 }
 0x18b   : > { %v776_v4 = vadd.f32 %v2525_v2, %v3382_v61  ;;  %v770_v5 = vpop.f32.mrb[15].mxu0  ;;  %v2528_v6 = vpop.f32.mrb[0].mxu1  ;;  %2748 = vmatprep.subr.msk.bf16.mxu0 %vm2747_vm2, %v2746_v57 }
 0x18c   : > { %v771_v7 = vadd.f32 %v3382_v61, %v770_v5  ;;  %v780_v8 = vpop.f32.mrb[1].mxu1  ;;  %2600 = vmatprep.mubr.f32.mxu1 %v871_v1  ;;  %v786_v12 = vadd.f32 %v2528_v6, %v3382_v61  ;;  %2751 = vmatpush3.bf16.msk.msra.mxu0 %vm2747_vm2, %v2746_v57 }
 0x18d   : > { %v781_v9 = vadd.f32 %v3382_v61, %v780_v8  ;;  %2601 = vmatmul.mubr.f32.gmra.mrb[28].mxu1 %v872_v3  ;;  %v874_v11 = vmax.f32 %v776_v4, 0.0 }
 0x18e   : > { %v873_v10 = vmax.f32 %v771_v7, 0.0  ;;  %v876_v17 = vmax.f32 %v786_v12, 0.0 }
 0x18f   : > { %v875_v13 = vmax.f32 %v781_v9, 0.0  ;;  %v2531_v14 = vpop.f32.mrb[2].mxu1 }
 0x190   : > { %v790_v15 = vpop.f32.mrb[3].mxu1  ;;  %2603 = vmatprep.mubr.f32.mxu1 %v873_v10  ;;  %v796_v18 = vadd.f32 %v2531_v14, %v3382_v61 }
 0x191   : > { %v791_v16 = vadd.f32 %v3382_v61, %v790_v15  ;;  %2604 = vmatmul.mubr.f32.gmra.mrb[30].mxu1 %v874_v11 }
 0x192   : > { %2606 = vmatprep.mubr.f32.mxu1 %v875_v13  ;;  %v878_v22 = vmax.f32 %v796_v18, 0.0 }
 0x193   : > { %v877_v19 = vmax.f32 %v791_v16, 0.0  ;;  %v2534_v20 = vpop.f32.mrb[4].mxu1 }
 0x194   : > { %v800_v21 = vpop.f32.mrb[5].mxu1  ;;  %v806_v23 = vadd.f32 %v2534_v20, %v3382_v61 }
 0x195   : > { %v801_v60 = vadd.f32 %v3382_v61, %v800_v21  ;;  %2607 = vmatmul.mubr.f32.gmra.mrb[32].mxu1 %v876_v17 }
 0x196   : > { %2609 = vmatprep.mubr.f32.mxu1 %v877_v19  ;;  %v880_v28 = vmax.f32 %v806_v23, 0.0 }
 0x197   : > { %v879_v24 = vmax.f32 %v801_v60, 0.0  ;;  %v2537_v25 = vpop.f32.mrb[6].mxu1 }
 0x198   : > { %v810_v26 = vpop.f32.mrb[7].mxu1  ;;  %v816_v29 = vadd.f32 %v2537_v25, %v3382_v61 }
 0x199   : > { %v811_v27 = vadd.f32 %v3382_v61, %v810_v26  ;;  %2610 = vmatmul.mubr.f32.gmra.mrb[34].mxu1 %v878_v22 }
 0x19a   : > { %2612 = vmatprep.mubr.f32.mxu1 %v879_v24  ;;  %v882_v33 = vmax.f32 %v816_v29, 0.0 }
 0x19b   : > { %v881_v30 = vmax.f32 %v811_v27, 0.0  ;;  %v2540_v31 = vpop.f32.mrb[8].mxu1 }
 0x19c   : > { %v820_v32 = vpop.f32.mrb[9].mxu1  ;;  %v826_v34 = vadd.f32 %v2540_v31, %v3382_v61 }
 0x19d   : > { %v821_v59 = vadd.f32 %v3382_v61, %v820_v32  ;;  %2613 = vmatmul.mubr.f32.gmra.mrb[36].mxu1 %v880_v28 }
 0x19e   : > { %2615 = vmatprep.mubr.f32.mxu1 %v881_v30  ;;  %v884_v39 = vmax.f32 %v826_v34, 0.0 }
 0x19f   : > { %v883_v35 = vmax.f32 %v821_v59, 0.0  ;;  %v2543_v36 = vpop.f32.mrb[10].mxu1 }
 0x1a0   : > { %v830_v37 = vpop.f32.mrb[11].mxu1  ;;  %v836_v40 = vadd.f32 %v2543_v36, %v3382_v61 }
 0x1a1   : > { %v831_v38 = vadd.f32 %v3382_v61, %v830_v37  ;;  %2616 = vmatmul.mubr.f32.gmra.mrb[38].mxu1 %v882_v33 }
 0x1a2   : > { %2618 = vmatprep.mubr.f32.mxu1 %v883_v35  ;;  %v886_v45 = vmax.f32 %v836_v40, 0.0 }
 0x1a3   : > { %v885_v41 = vmax.f32 %v831_v38, 0.0  ;;  %v2546_v42 = vpop.f32.mrb[12].mxu1 }
 0x1a4   : > { %v840_v43 = vpop.f32.mrb[13].mxu1  ;;  %v846_v46 = vadd.f32 %v2546_v42, %v3382_v61 }
 0x1a5   : > { %v841_v44 = vadd.f32 %v3382_v61, %v840_v43  ;;  %2619 = vmatmul.mubr.f32.gmra.mrb[40].mxu1 %v884_v39 }
 0x1a6   : > { %2621 = vmatprep.mubr.f32.mxu1 %v885_v41  ;;  %v888_v51 = vmax.f32 %v846_v46, 0.0 }
 0x1a7   : > { %v887_v47 = vmax.f32 %v841_v44, 0.0  ;;  %v2549_v48 = vpop.f32.mrb[14].mxu1 }
 0x1a8   : > { %v850_v49 = vpop.f32.mrb[15].mxu1  ;;  %v856_v52 = vadd.f32 %v2549_v48, %v3382_v61 }
 0x1a9   : > { %v851_v50 = vadd.f32 %v3382_v61, %v850_v49  ;;  %2622 = vmatmul.mubr.f32.gmra.mrb[42].mxu1 %v886_v45  ;;  %v3425_v61 = vld [vmem:[%s3947_s6] ss:$0 sm:$0xff] }
 0x1aa   : > { %2624 = vmatprep.mubr.f32.mxu1 %v887_v47  ;;  %v890_v54 = vmax.f32 %v856_v52, 0.0 }
 0x1ab   : > { %v889_v53 = vmax.f32 %v851_v50, 0.0 }
 0x1ad   : > { %2625 = vmatmul.mubr.f32.gmra.mrb[44].mxu1 %v888_v51 }
 0x1ae   : > { %2627 = vmatprep.mubr.f32.mxu1 %v889_v53 }
 0x1b1   : > { %2628 = vmatmul.mubr.f32.gmra.mrb[46].mxu1 %v890_v54 }
 0x248   : > { %v2584_v58 = vpop.f32.mrb[16].mxu1 }
 0x249   : > { %v986_v62 = vadd.f32 %v2584_v58, %v3425_v61  ;;  %v980_v63 = vpop.f32.mrb[17].mxu1 }
 0x24a   : > { %v981_v0 = vadd.f32 %v3425_v61, %v980_v63 }
 0x24b   : > { %v1140_v1 = vsub.f32 0.0, %v986_v62 }
 0x24c   : > { %v1139_v2 = vsub.f32 0.0, %v981_v0  ;;  %v2587_v3 = vpop.f32.mrb[18].mxu1 }
 0x24d   : > { %v1173_v4 = vmul.f32 1.442695, %v1140_v1  ;;  %v996_v5 = vadd.f32 %v2587_v3, %v3425_v61  ;;  %v990_v6 = vpop.f32.mrb[19].mxu1 }
 0x24e   : > { %v1171_v7 = vmul.f32 1.442695, %v1139_v2  ;;  %v991_v8 = vadd.f32 %v3425_v61, %v990_v6 }
 0x24f   : > { %2780 = vpow2.f32 %v1173_v4  ;;  %v1142_v9 = vsub.f32 0.0, %v996_v5 }
 0x250   : > { %2782 = vpow2.f32 %v1171_v7  ;;  %v1141_v10 = vsub.f32 0.0, %v991_v8  ;;  %v2590_v11 = vpop.f32.mrb[20].mxu1 }
 0x251   : > { %v1177_v12 = vmul.f32 1.442695, %v1142_v9  ;;  %v1006_v13 = vadd.f32 %v2590_v11, %v3425_v61  ;;  %v1000_v14 = vpop.f32.mrb[21].mxu1 }
 0x252   : > { %v1175_v15 = vmul.f32 1.442695, %v1141_v10  ;;  %v1001_v16 = vadd.f32 %v3425_v61, %v1000_v14 }
 0x253   : > { %2784 = vpow2.f32 %v1177_v12  ;;  %v1144_v17 = vsub.f32 0.0, %v1006_v13 }
 0x254   : > { %2786 = vpow2.f32 %v1175_v15  ;;  %v1143_v18 = vsub.f32 0.0, %v1001_v16  ;;  %v2593_v19 = vpop.f32.mrb[22].mxu1 }
 0x255   : > { %v1181_v20 = vmul.f32 1.442695, %v1144_v17  ;;  %v1016_v21 = vadd.f32 %v2593_v19, %v3425_v61  ;;  %v1010_v60 = vpop.f32.mrb[23].mxu1 }
 0x256   : > { %v1179_v22 = vmul.f32 1.442695, %v1143_v18  ;;  %v1011_v23 = vadd.f32 %v3425_v61, %v1010_v60 }
 0x257   : > { %2788 = vpow2.f32 %v1181_v20  ;;  %v1146_v24 = vsub.f32 0.0, %v1016_v21 }
 0x258   : > { %2790 = vpow2.f32 %v1179_v22  ;;  %v1145_v25 = vsub.f32 0.0, %v1011_v23  ;;  %v2596_v26 = vpop.f32.mrb[24].mxu1 }
 0x259   : > { %v2781_v27 = vpop.eup %2780  ;;  %v1185_v28 = vmul.f32 1.442695, %v1146_v24  ;;  %v1026_v29 = vadd.f32 %v2596_v26, %v3425_v61  ;;  %v1020_v30 = vpop.f32.mrb[25].mxu1 }
 0x25a   : > { %v2783_v31 = vpop.eup %2782  ;;  %v1236_v32 = vadd.f32 1.0, %v2781_v27  ;;  %v1183_v59 = vmul.f32 1.442695, %v1145_v25  ;;  %v1021_v33 = vadd.f32 %v3425_v61, %v1020_v30 }
 0x25b   : > { %v1235_v34 = vadd.f32 1.0, %v2783_v31  ;;  %2792 = vpow2.f32 %v1185_v28  ;;  %v1148_v35 = vsub.f32 0.0, %v1026_v29 }
 0x25c   : > { %2794 = vrcp.f32 %v1236_v32  ;;  %v1147_v36 = vsub.f32 0.0, %v1021_v33  ;;  %v2599_v37 = vpop.f32.mrb[26].mxu1 }
 0x25d   : > { %v2785_v38 = vpop.eup %2784  ;;  %2796 = vrcp.f32 %v1235_v34  ;;  %v1189_v39 = vmul.f32 1.442695, %v1148_v35  ;;  %v1036_v40 = vadd.f32 %v2599_v37, %v3425_v61  ;;  %v1030_v41 = vpop.f32.mrb[27].mxu1 }
 0x25e   : > { %v2787_v42 = vpop.eup %2786  ;;  %v1238_v43 = vadd.f32 1.0, %v2785_v38  ;;  %2798 = vpow2.f32 %v1183_v59  ;;  %v1187_v44 = vmul.f32 1.442695, %v1147_v36  ;;  %v1031_v45 = vadd.f32 %v3425_v61, %v1030_v41 }
 0x25f   : > { %v1237_v46 = vadd.f32 1.0, %v2787_v42  ;;  %2800 = vpow2.f32 %v1189_v39  ;;  %v1150_v47 = vsub.f32 0.0, %v1036_v40 }
 0x260   : > { %2802 = vrcp.f32 %v1238_v43  ;;  %v1149_v48 = vsub.f32 0.0, %v1031_v45  ;;  %v2602_v49 = vpop.f32.mrb[28].mxu1 }
 0x261   : > { %v2789_v50 = vpop.eup %2788  ;;  %2804 = vrcp.f32 %v1237_v46  ;;  %v1193_v51 = vmul.f32 1.442695, %v1150_v47  ;;  %v1046_v52 = vadd.f32 %v2602_v49, %v3425_v61  ;;  %v1040_v53 = vpop.f32.mrb[29].mxu1 }
 0x262   : > { %v2791_v54 = vpop.eup %2790  ;;  %v1240_v55 = vadd.f32 1.0, %v2789_v50  ;;  %2806 = vpow2.f32 %v1187_v44  ;;  %v1191_v56 = vmul.f32 1.442695, %v1149_v48  ;;  %v1041_v57 = vadd.f32 %v3425_v61, %v1040_v53 }
 0x263   : > { %v1239_v58 = vadd.f32 1.0, %v2791_v54  ;;  %2808 = vpow2.f32 %v1193_v51  ;;  %v1152_v62 = vsub.f32 0.0, %v1046_v52 }
 0x264   : > { %2810 = vrcp.f32 %v1240_v55  ;;  %v1151_v63 = vsub.f32 0.0, %v1041_v57  ;;  %v2605_v0 = vpop.f32.mrb[30].mxu1 }
 0x265   : > { %v2793_v1 = vpop.eup %2792  ;;  %2812 = vrcp.f32 %v1239_v58  ;;  %v1197_v2 = vmul.f32 1.442695, %v1152_v62  ;;  %v1056_v3 = vadd.f32 %v2605_v0, %v3425_v61  ;;  %v1050_v4 = vpop.f32.mrb[31].mxu1 }
 0x266   : > { %v2795_v5 = vpop.eup %2794  ;;  %v1242_v6 = vadd.f32 1.0, %v2793_v1  ;;  %2814 = vpow2.f32 %v1191_v56  ;;  %v1195_v7 = vmul.f32 1.442695, %v1151_v63  ;;  %v1051_v8 = vadd.f32 %v3425_v61, %v1050_v4 }
 0x267   : > { %v2797_v9 = vpop.eup %2796  ;;  %2816 = vpow2.f32 %v1197_v2  ;;  %v1154_v10 = vsub.f32 0.0, %v1056_v3  ;;  %v1628_v11 = vmul.f32 %v2795_v5, %v2795_v5 }
 0x268   : > { %v2799_v12 = vpop.eup %2798  ;;  %2818 = vrcp.f32 %v1242_v6  ;;  %v1153_v13 = vsub.f32 0.0, %v1051_v8  ;;  %v2608_v14 = vpop.f32.mrb[32].mxu1  ;;  %2634 = vmatprep.mubr.msk.f32.mxu0 %vm1301_vm3, %v2797_v9  ;;  %v1627_v15 = vmul.f32 %v2797_v9, %v2797_v9 }
 0x269   : > { %v2801_v16 = vpop.eup %2800  ;;  %v1241_v17 = vadd.f32 1.0, %v2799_v12  ;;  %2820 = vpow2.f32 %v1195_v7  ;;  %v1201_v18 = vmul.f32 1.442695, %v1154_v10  ;;  %v1066_v19 = vadd.f32 %v2608_v14, %v3425_v61  ;;  %v1060_v20 = vpop.f32.mrb[33].mxu1  ;;  %2635 = vmatmul.mubr.msk.f32.vlgmr.msra.gmra.mrb[16].mxu0 %vm1301_vm3, %v2795_v5 }
 0x26a   : > { %v2803_v21 = vpop.eup %2802  ;;  %v1244_v60 = vadd.f32 1.0, %v2801_v16  ;;  %v1199_v22 = vmul.f32 1.442695, %v1153_v13  ;;  %v1061_v23 = vadd.f32 %v3425_v61, %v1060_v20  ;;  %v1662_v24 = vsel %vm1301_vm3, %v1628_v11, 0.0 }
 0x26b   : > { %v2805_v25 = vpop.eup %2804  ;;  %2822 = vrcp.f32 %v1241_v17  ;;  %v1156_v26 = vsub.f32 0.0, %v1066_v19  ;;  %1663 = vadd.xlane.f32.xlu1 %v1662_v24  ;;  %v1659_v27 = vsel %vm1301_vm3, %v1627_v15, 0.0  ;;  %v1630_v28 = vmul.f32 %v2803_v21, %v2803_v21 }
 0x26c   : > { %v2807_v29 = vpop.eup %2806  ;;  %2824 = vrcp.f32 %v1244_v60  ;;  %v1155_v30 = vsub.f32 0.0, %v1061_v23  ;;  %1660 = vadd.xlane.f32.xlu0 %v1659_v27  ;;  %v2611_v31 = vpop.f32.mrb[34].mxu1  ;;  %2637 = vmatprep.mubr.msk.f32.mxu0 %vm1301_vm3, %v2805_v25  ;;  %v1629_v32 = vmul.f32 %v2805_v25, %v2805_v25 }
 0x26d   : > { %v2809_v59 = vpop.eup %2808  ;;  %v1243_v33 = vadd.f32 1.0, %v2807_v29  ;;  %2826 = vpow2.f32 %v1201_v18  ;;  %v1205_v34 = vmul.f32 1.442695, %v1156_v26  ;;  %v1076_v35 = vadd.f32 %v2611_v31, %v3425_v61  ;;  %v1070_v36 = vpop.f32.mrb[35].mxu1  ;;  %2638 = vmatmul.mubr.msk.f32.gmra.mrb[18].mxu0 %vm1301_vm3, %v2803_v21 }
 0x26e   : > { %v2811_v37 = vpop.eup %2810  ;;  %v1246_v38 = vadd.f32 1.0, %v2809_v59  ;;  %2828 = vpow2.f32 %v1199_v22  ;;  %v1203_v39 = vmul.f32 1.442695, %v1155_v30  ;;  %v1071_v40 = vadd.f32 %v3425_v61, %v1070_v36 }
 0x26f   : > { %v2813_v41 = vpop.eup %2812  ;;  %2830 = vrcp.f32 %v1243_v33  ;;  %v1158_v42 = vsub.f32 0.0, %v1076_v35  ;;  %v1668_v43 = vsel %vm1301_vm3, %v1630_v28, 0.0  ;;  %v1632_v48 = vmul.f32 %v2811_v37, %v2811_v37 }
 0x270   : > { %v2815_v44 = vpop.eup %2814  ;;  %2832 = vrcp.f32 %v1246_v38  ;;  %v1157_v45 = vsub.f32 0.0, %v1071_v40  ;;  %1669 = vadd.xlane.f32.xlu0 %v1668_v43  ;;  %v2614_v46 = vpop.f32.mrb[36].mxu1  ;;  %2640 = vmatprep.mubr.msk.f32.mxu0 %vm1301_vm3, %v2813_v41  ;;  %v1631_v47 = vmul.f32 %v2813_v41, %v2813_v41  ;;  %v1665_v57 = vsel %vm1301_vm3, %v1629_v32, 0.0 }
 0x271   : > { %v2817_v49 = vpop.eup %2816  ;;  %v1245_v50 = vadd.f32 1.0, %v2815_v44  ;;  %2834 = vpow2.f32 %v1205_v34  ;;  %v1209_v51 = vmul.f32 1.442695, %v1158_v42  ;;  %v1086_v52 = vadd.f32 %v2614_v46, %v3425_v61  ;;  %v1080_v53 = vpop.f32.mrb[37].mxu1  ;;  %2641 = vmatmul.mubr.msk.f32.gmra.mrb[20].mxu0 %vm1301_vm3, %v2811_v37 }
 0x272   : > { %v2819_v54 = vpop.eup %2818  ;;  %v1248_v55 = vadd.f32 1.0, %v2817_v49  ;;  %2836 = vpow2.f32 %v1203_v39  ;;  %v1081_v56 = vadd.f32 %v3425_v61, %v1080_v53  ;;  %v1207_v62 = vmul.f32 1.442695, %v1157_v45 }
 0x273   : > { %v2821_v58 = vpop.eup %2820  ;;  %2838 = vrcp.f32 %v1245_v50  ;;  %v1160_v63 = vsub.f32 0.0, %v1086_v52  ;;  %v1671_v0 = vsel %vm1301_vm3, %v1631_v47, 0.0  ;;  %v1634_v4 = vmul.f32 %v2819_v54, %v2819_v54 }
 0x274   : > { %2840 = vrcp.f32 %v1248_v55  ;;  %v1247_v1 = vadd.f32 1.0, %v2821_v58  ;;  %v1159_v2 = vsub.f32 0.0, %v1081_v56  ;;  %1672 = vadd.xlane.f32.xlu1 %v1671_v0  ;;  %1666 = vadd.xlane.f32.xlu0 %v1665_v57  ;;  %v2617_v3 = vpop.f32.mrb[38].mxu1  ;;  %v1674_v9 = vsel %vm1301_vm3, %v1632_v48, 0.0 }
 0x275   : > { %v2823_v5 = vpop.eup %2822  ;;  %2842 = vpow2.f32 %v1209_v51  ;;  %v1213_v6 = vmul.f32 1.442695, %v1160_v63  ;;  %v1096_v7 = vadd.f32 %v2617_v3, %v3425_v61  ;;  %v1090_v8 = vpop.f32.mrb[39].mxu1  ;;  %v1680_v16 = vsel %vm1301_vm3, %v1634_v4, 0.0 }
 0x276   : > { %v2825_v10 = vpop.eup %2824  ;;  %2844 = vrcp.f32 %v1247_v1  ;;  %v1211_v11 = vmul.f32 1.442695, %v1159_v2  ;;  %2643 = vmatprep.mubr.msk.f32.mxu0 %vm1301_vm3, %v2823_v5  ;;  %v1091_v12 = vadd.f32 %v3425_v61, %v1090_v8  ;;  %v1633_v13 = vmul.f32 %v2823_v5, %v2823_v5 }
 0x277   : > { %v2827_v14 = vpop.eup %2826  ;;  %2846 = vpow2.f32 %v1207_v62  ;;  %v1162_v15 = vsub.f32 0.0, %v1096_v7  ;;  %2644 = vmatmul.mubr.msk.f32.gmra.mrb[22].mxu0 %vm1301_vm3, %v2819_v54  ;;  %v1636_v17 = vmul.f32 %v2825_v10, %v2825_v10 }
 0x278   : > { %v2829_v18 = vpop.eup %2828  ;;  %v1250_v19 = vadd.f32 1.0, %v2827_v14  ;;  %2848 = vpow2.f32 %v1213_v6  ;;  %v1161_v20 = vsub.f32 0.0, %v1091_v12  ;;  %v1677_v21 = vsel %vm1301_vm3, %v1633_v13, 0.0  ;;  %1675 = vadd.xlane.f32.xlu0 %v1674_v9  ;;  %v2620_v60 = vpop.f32.mrb[40].mxu1 }
 0x279   : > { %v2831_v22 = vpop.eup %2830  ;;  %v1249_v23 = vadd.f32 1.0, %v2829_v18  ;;  %2850 = vpow2.f32 %v1211_v11  ;;  %v1217_v24 = vmul.f32 1.442695, %v1162_v15  ;;  %1678 = vadd.xlane.f32.xlu1 %v1677_v21  ;;  %v1106_v25 = vadd.f32 %v2620_v60, %v3425_v61  ;;  %v1100_v26 = vpop.f32.mrb[41].mxu1 }
 0x27a   : > { %v2833_v27 = vpop.eup %2832  ;;  %2852 = vrcp.f32 %v1250_v19  ;;  %v1215_v28 = vmul.f32 1.442695, %v1161_v20  ;;  %2646 = vmatprep.mubr.msk.f32.mxu0 %vm1301_vm3, %v2831_v22  ;;  %v1101_v29 = vadd.f32 %v3425_v61, %v1100_v26  ;;  %v1635_v30 = vmul.f32 %v2831_v22, %v2831_v22 }
 0x27b   : > { %v2835_v31 = vpop.eup %2834  ;;  %2854 = vrcp.f32 %v1249_v23  ;;  %v1164_v32 = vsub.f32 0.0, %v1106_v25  ;;  %2647 = vmatmul.mubr.msk.f32.gmra.mrb[24].mxu0 %vm1301_vm3, %v2825_v10  ;;  %v1686_v59 = vsel %vm1301_vm3, %v1636_v17, 0.0  ;;  %v1638_v33 = vmul.f32 %v2833_v27, %v2833_v27 }
 0x27c   : > { %v2837_v34 = vpop.eup %2836  ;;  %v1252_v35 = vadd.f32 1.0, %v2835_v31  ;;  %2856 = vpow2.f32 %v1217_v24  ;;  %v1163_v36 = vsub.f32 0.0, %v1101_v29  ;;  %v1683_v37 = vsel %vm1301_vm3, %v1635_v30, 0.0  ;;  %1681 = vadd.xlane.f32.xlu0 %v1680_v16  ;;  %v2623_v38 = vpop.f32.mrb[42].mxu1 }
 0x27d   : > { %v2839_v39 = vpop.eup %2838  ;;  %v1251_v40 = vadd.f32 1.0, %v2837_v34  ;;  %2858 = vpow2.f32 %v1215_v28  ;;  %v1221_v41 = vmul.f32 1.442695, %v1164_v32  ;;  %1684 = vadd.xlane.f32.xlu1 %v1683_v37  ;;  %v1116_v42 = vadd.f32 %v2623_v38, %v3425_v61  ;;  %v1110_v43 = vpop.f32.mrb[43].mxu1 }
 0x27e   : > { %v2841_v44 = vpop.eup %2840  ;;  %2860 = vrcp.f32 %v1252_v35  ;;  %v1219_v45 = vmul.f32 1.442695, %v1163_v36  ;;  %2649 = vmatprep.mubr.msk.f32.mxu0 %vm1301_vm3, %v2839_v39  ;;  %v1111_v46 = vadd.f32 %v3425_v61, %v1110_v43  ;;  %v1637_v47 = vmul.f32 %v2839_v39, %v2839_v39 }
 0x27f   : > { %v2843_v48 = vpop.eup %2842  ;;  %2862 = vrcp.f32 %v1251_v40  ;;  %v1166_v49 = vsub.f32 0.0, %v1116_v42  ;;  %2650 = vmatmul.mubr.msk.f32.gmra.mrb[26].mxu0 %vm1301_vm3, %v2833_v27  ;;  %v1692_v50 = vsel %vm1301_vm3, %v1638_v33, 0.0  ;;  %v1640_v51 = vmul.f32 %v2841_v44, %v2841_v44 }
 0x280   : > { %v2845_v52 = vpop.eup %2844  ;;  %v1254_v53 = vadd.f32 1.0, %v2843_v48  ;;  %2864 = vpow2.f32 %v1221_v41  ;;  %v1165_v54 = vsub.f32 0.0, %v1111_v46  ;;  %v1689_v55 = vsel %vm1301_vm3, %v1637_v47, 0.0  ;;  %1687 = vadd.xlane.f32.xlu0 %v1686_v59  ;;  %v2626_v56 = vpop.f32.mrb[44].mxu1 }
 0x281   : > { %v2847_v57 = vpop.eup %2846  ;;  %2866 = vpow2.f32 %v1219_v45  ;;  %v1225_v58 = vmul.f32 1.442695, %v1166_v49  ;;  %1690 = vadd.xlane.f32.xlu1 %v1689_v55  ;;  %v1126_v62 = vadd.f32 %v2626_v56, %v3425_v61  ;;  %2652 = vmatprep.mubr.msk.f32.mxu0 %vm1301_vm3, %v2845_v52  ;;  %v1120_v63 = vpop.f32.mrb[45].mxu1  ;;  %v1639_v0 = vmul.f32 %v2845_v52, %v2845_v52 }
 0x282   : > { %v2849_v1 = vpop.eup %2848  ;;  %2868 = vrcp.f32 %v1254_v53  ;;  %v1253_v2 = vadd.f32 1.0, %v2847_v57  ;;  %v1223_v3 = vmul.f32 1.442695, %v1165_v54  ;;  %v1121_v4 = vadd.f32 %v3425_v61, %v1120_v63 }
 0x283   : > { %v2851_v5 = vpop.eup %2850  ;;  %v1256_v6 = vadd.f32 1.0, %v2849_v1  ;;  %2870 = vpow2.f32 %v1225_v58  ;;  %v1168_v7 = vsub.f32 0.0, %v1126_v62  ;;  %2653 = vmatmul.mubr.msk.f32.gmra.mrb[28].mxu0 %vm1301_vm3, %v2841_v44  ;;  %v1695_v8 = vsel %vm1301_vm3, %v1639_v0, 0.0 }
 0x284   : > { %v2853_v9 = vpop.eup %2852  ;;  %2872 = vrcp.f32 %v1253_v2  ;;  %v1255_v10 = vadd.f32 1.0, %v2851_v5  ;;  %v1167_v11 = vsub.f32 0.0, %v1121_v4  ;;  %1693 = vadd.xlane.f32.xlu0 %v1692_v50  ;;  %v2629_v12 = vpop.f32.mrb[46].mxu1  ;;  %v1698_v17 = vsel %vm1301_vm3, %v1640_v51, 0.0 }
 0x285   : > { %v2855_v13 = vpop.eup %2854  ;;  %2874 = vrcp.f32 %v1256_v6  ;;  %v1229_v14 = vmul.f32 1.442695, %v1168_v7  ;;  %1696 = vadd.xlane.f32.xlu1 %v1695_v8  ;;  %v1136_v15 = vadd.f32 %v2629_v12, %v3425_v61  ;;  %v1130_v16 = vpop.f32.mrb[47].mxu1  ;;  %v1642_v21 = vmul.f32 %v2853_v9, %v2853_v9 }
 0x286   : > { %v2857_v18 = vpop.eup %2856  ;;  %2876 = vrcp.f32 %v1255_v10  ;;  %2655 = vmatprep.mubr.msk.f32.mxu0 %vm1301_vm3, %v2855_v13  ;;  %v1131_v19 = vadd.f32 %v3425_v61, %v1130_v16  ;;  %v1641_v20 = vmul.f32 %v2855_v13, %v2855_v13  ;;  %v1227_v23 = vmul.f32 1.442695, %v1167_v11 }
 0x287   : > { %v2859_v60 = vpop.eup %2858  ;;  %v1258_v22 = vadd.f32 1.0, %v2857_v18  ;;  %2878 = vpow2.f32 %v1223_v3  ;;  %v1170_v24 = vsub.f32 0.0, %v1136_v15  ;;  %2656 = vmatmul.mubr.msk.f32.gmra.mrb[30].mxu0 %vm1301_vm3, %v2853_v9  ;;  %v1704_v32 = vsel %vm1301_vm3, %v1642_v21, 0.0 }
 0x288   : > { %v2861_v25 = vpop.eup %2860  ;;  %v1257_v26 = vadd.f32 1.0, %v2859_v60  ;;  %2880 = vpow2.f32 %v1229_v14  ;;  %v1169_v27 = vsub.f32 0.0, %v1131_v19  ;;  %v1701_v28 = vsel %vm1301_vm3, %v1641_v20, 0.0  ;;  %1699 = vadd.xlane.f32.xlu0 %v1698_v17 }
 0x289   : > { %v2863_v29 = vpop.eup %2862  ;;  %2882 = vrcp.f32 %v1258_v22  ;;  %v1233_v30 = vmul.f32 1.442695, %v1170_v24  ;;  %1702 = vadd.xlane.f32.xlu1 %v1701_v28  ;;  %v1644_v35 = vmul.f32 %v2861_v25, %v2861_v25 }
 0x28a   : > { %v2865_v61 = vpop.eup %2864  ;;  %2884 = vrcp.f32 %v1257_v26  ;;  %2658 = vmatprep.mubr.msk.f32.mxu0 %vm1301_vm3, %v2863_v29  ;;  %v1643_v31 = vmul.f32 %v2863_v29, %v2863_v29  ;;  %v1231_v34 = vmul.f32 1.442695, %v1169_v27 }
 0x28b   : > { %v2867_v59 = vpop.eup %2866  ;;  %v1260_v33 = vadd.f32 1.0, %v2865_v61  ;;  %2886 = vpow2.f32 %v1227_v23  ;;  %2659 = vmatmul.mubr.msk.f32.gmra.mrb[32].mxu0 %vm1301_vm3, %v2861_v25  ;;  %v1710_v44 = vsel %vm1301_vm3, %v1644_v35, 0.0 }
 0x28c   : > { %v2869_v36 = vpop.eup %2868  ;;  %v1259_v37 = vadd.f32 1.0, %v2867_v59  ;;  %2888 = vpow2.f32 %v1233_v30  ;;  %v1707_v38 = vsel %vm1301_vm3, %v1643_v31, 0.0  ;;  %1705 = vadd.xlane.f32.xlu0 %v1704_v32 }
 0x28d   : > { %v2871_v39 = vpop.eup %2870  ;;  %2890 = vrcp.f32 %v1260_v33  ;;  %1708 = vadd.xlane.f32.xlu1 %v1707_v38  ;;  %v1646_v45 = vmul.f32 %v2869_v36, %v2869_v36 }
 0x28e   : > { %v2873_v40 = vpop.eup %2872  ;;  %2892 = vrcp.f32 %v1259_v37  ;;  %v1262_v41 = vadd.f32 1.0, %v2871_v39 }
 0x28f   : > { %v2875_v42 = vpop.eup %2874  ;;  %2894 = vpow2.f32 %v1231_v34  ;;  %2661 = vmatprep.mubr.msk.f32.mxu0 %vm1301_vm3, %v2873_v40  ;;  %v1645_v43 = vmul.f32 %v2873_v40, %v2873_v40  ;;  %v1716_v55 = vsel %vm1301_vm3, %v1646_v45, 0.0 }
 0x290   : > { %v2877_v46 = vpop.eup %2876  ;;  %2662 = vmatmul.mubr.msk.f32.gmra.mrb[34].mxu0 %vm1301_vm3, %v2869_v36  ;;  %1711 = vadd.xlane.f32.xlu0 %v1710_v44  ;;  %2896 = vrcp.f32 %v1262_v41  ;;  %v1648_v56 = vmul.f32 %v2875_v42, %v2875_v42 }
 0x291   : > { %v2879_v47 = vpop.eup %2878  ;;  %v1713_v48 = vsel %vm1301_vm3, %v1645_v43, 0.0  ;;  %2664 = vmatprep.mubr.msk.f32.mxu0 %vm1301_vm3, %v2877_v46  ;;  %v1647_v49 = vmul.f32 %v2877_v46, %v2877_v46 }
 0x292   : > { %v2881_v50 = vpop.eup %2880  ;;  %v1261_v51 = vadd.f32 1.0, %v2879_v47  ;;  %1714 = vadd.xlane.f32.xlu1 %v1713_v48  ;;  %v1722_v4 = vsel %vm1301_vm3, %v1648_v56, 0.0 }
 0x293   : > { %v2883_v52 = vpop.eup %2882  ;;  %v1264_v53 = vadd.f32 1.0, %v2881_v50  ;;  %v1719_v54 = vsel %vm1301_vm3, %v1647_v49, 0.0 }
 0x294   : > { %v2885_v57 = vpop.eup %2884  ;;  %2898 = vrcp.f32 %v1261_v51  ;;  %2665 = vmatmul.mubr.msk.f32.gmra.mrb[36].mxu0 %vm1301_vm3, %v2875_v42  ;;  %1717 = vadd.xlane.f32.xlu0 %v1716_v55  ;;  %v1650_v5 = vmul.f32 %v2883_v52, %v2883_v52 }
 0x295   : > { %v2887_v58 = vpop.eup %2886  ;;  %2667 = vmatprep.mubr.msk.f32.mxu0 %vm1301_vm3, %v2885_v57  ;;  %v1649_v62 = vmul.f32 %v2885_v57, %v2885_v57  ;;  %2900 = vrcp.f32 %v1264_v53 }
 0x296   : > { %v2889_v63 = vpop.eup %2888  ;;  %v1263_v0 = vadd.f32 1.0, %v2887_v58  ;;  %1720 = vadd.xlane.f32.xlu1 %v1719_v54  ;;  %v1728_v11 = vsel %vm1301_vm3, %v1650_v5, 0.0 }
 0x297   : > { %v2891_v1 = vpop.eup %2890  ;;  %v1266_v2 = vadd.f32 1.0, %v2889_v63  ;;  %v1725_v3 = vsel %vm1301_vm3, %v1649_v62, 0.0 }
 0x298   : > { %v2893_v6 = vpop.eup %2892  ;;  %2902 = vrcp.f32 %v1263_v0  ;;  %2668 = vmatmul.mubr.msk.f32.gmra.mrb[38].mxu0 %vm1301_vm3, %v2883_v52  ;;  %1723 = vadd.xlane.f32.xlu0 %v1722_v4  ;;  %v1652_v12 = vmul.f32 %v2891_v1, %v2891_v1 }
 0x299   : > { %v2895_v7 = vpop.eup %2894  ;;  %2670 = vmatprep.mubr.msk.f32.mxu0 %vm1301_vm3, %v2893_v6  ;;  %v1651_v8 = vmul.f32 %v2893_v6, %v2893_v6  ;;  %2904 = vrcp.f32 %v1266_v2 }
 0x29a   : > { %v1265_v9 = vadd.f32 1.0, %v2895_v7  ;;  %1726 = vadd.xlane.f32.xlu1 %v1725_v3  ;;  %v2897_v13 = vpop.eup %2896  ;;  %v1734_v16 = vsel %vm1301_vm3, %v1652_v12, 0.0 }
 0x29b   : > { %v1731_v10 = vsel %vm1301_vm3, %v1651_v8, 0.0  ;;  %v1654_v17 = vmul.f32 %v2897_v13, %v2897_v13 }
 0x29c   : > { %2906 = vrcp.f32 %v1265_v9  ;;  %2671 = vmatmul.mubr.msk.f32.gmra.mrb[40].mxu0 %vm1301_vm3, %v2891_v1  ;;  %1729 = vadd.xlane.f32.xlu0 %v1728_v11 }
 0x29d   : > { %v1740_v60 = vsel %vm1301_vm3, %v1654_v17, 0.0 }
 0x29e   : > { %v2899_v14 = vpop.eup %2898  ;;  %1732 = vadd.xlane.f32.xlu1 %v1731_v10 }
 0x29f   : > { %2673 = vmatprep.mubr.msk.f32.mxu0 %vm1301_vm3, %v2899_v14  ;;  %v1653_v15 = vmul.f32 %v2899_v14, %v2899_v14  ;;  %v2901_v18 = vpop.eup %2900 }
 0x2a0   : > { %2674 = vmatmul.mubr.msk.f32.gmra.mrb[42].mxu0 %vm1301_vm3, %v2897_v13  ;;  %1735 = vadd.xlane.f32.xlu0 %v1734_v16  ;;  %v1656_v22 = vmul.f32 %v2901_v18, %v2901_v18 }
 0x2a1   : > { %v1737_v19 = vsel %vm1301_vm3, %v1653_v15, 0.0 }
 0x2a2   : > { %v2903_v20 = vpop.eup %2902  ;;  %1738 = vadd.xlane.f32.xlu1 %v1737_v19  ;;  %v1746_v26 = vsel %vm1301_vm3, %v1656_v22, 0.0 }
 0x2a3   : > { %2676 = vmatprep.mubr.msk.f32.mxu0 %vm1301_vm3, %v2903_v20  ;;  %v1655_v21 = vmul.f32 %v2903_v20, %v2903_v20  ;;  %v2905_v23 = vpop.eup %2904 }
 0x2a4   : > { %2677 = vmatmul.mubr.msk.f32.gmra.mrb[44].mxu0 %vm1301_vm3, %v2901_v18  ;;  %1741 = vadd.xlane.f32.xlu0 %v1740_v60  ;;  %v1658_v28 = vmul.f32 %v2905_v23, %v2905_v23 }
 0x2a5   : > { %v1743_v24 = vsel %vm1301_vm3, %v1655_v21, 0.0 }
 0x2a6   : > { %v2907_v25 = vpop.eup %2906  ;;  %1744 = vadd.xlane.f32.xlu1 %v1743_v24  ;;  %v1752_v30 = vsel %vm1301_vm3, %v1658_v28, 0.0 }
 0x2a7   : > { %2679 = vmatprep.mubr.msk.f32.mxu0 %vm1301_vm3, %v2907_v25  ;;  %v1657_v27 = vmul.f32 %v2907_v25, %v2907_v25 }
 0x2a8   : > { %2680 = vmatmul.mubr.msk.f32.gmra.mrb[46].mxu0 %vm1301_vm3, %v2905_v23  ;;  %1747 = vadd.xlane.f32.xlu0 %v1746_v26 }
 0x2a9   : > { %v1749_v29 = vsel %vm1301_vm3, %v1657_v27, 0.0 }
 0x2aa   : > { %1750 = vadd.xlane.f32.xlu1 %v1749_v29 }
 0x2ac   : > { %1753 = vadd.xlane.f32.xlu0 %v1752_v30 }
 0x2f8   : > { %v1664_v59 = vpop.xlane.xlu1 %1663 }
 0x2f9   : > { %v1661_v61 = vpop.xlane.xlu0 %1660  ;;  %v1756_v39 = vmax.f32 %v1664_v59, 1e-16 }
 0x2fa   : > { %v1755_v41 = vmax.f32 %v1661_v61, 1e-16 }
 0x2fb   : > { %2908 = vrsqrt.f32 %v1756_v39 }
 0x2fc   : > { %2910 = vrsqrt.f32 %v1755_v41 }
 0x2fd   : > { %v1670_v31 = vpop.xlane.xlu0 %1669 }
 0x2fe   : > { %v1758_v43 = vmax.f32 %v1670_v31, 1e-16 }
 0x300   : > { %2912 = vrsqrt.f32 %v1758_v43 }
 0x301   : > { %v1667_v32 = vpop.xlane.xlu0 %1666  ;;  %v1673_v34 = vpop.xlane.xlu1 %1672 }
 0x302   : > { %v1757_v44 = vmax.f32 %v1667_v32, 1e-16  ;;  %v1759_v48 = vmax.f32 %v1673_v34, 1e-16 }
 0x304   : > { %2914 = vrsqrt.f32 %v1757_v44 }
 0x305   : > { %v1676_v33 = vpop.xlane.xlu0 %1675  ;;  %v2909_v51 = vpop.eup %2908 }
 0x306   : > { %v1679_v36 = vpop.xlane.xlu1 %1678  ;;  %v1760_v47 = vmax.f32 %v1676_v33, 1e-16  ;;  %v2911_v54 = vpop.eup %2910 }
 0x307   : > { %v1761_v55 = vmax.f32 %v1679_v36, 1e-16 }
 0x308   : > { %2916 = vrsqrt.f32 %v1760_v47 }
 0x309   : > { %v1682_v35 = vpop.xlane.xlu0 %1681  ;;  %2918 = vrsqrt.f32 %v1759_v48 }
 0x30a   : > { %v1685_v38 = vpop.xlane.xlu1 %1684  ;;  %v1762_v52 = vmax.f32 %v1682_v35, 1e-16  ;;  %v2913_v63 = vpop.eup %2912 }
 0x30b   : > { %v1763_v5 = vmax.f32 %v1685_v38, 1e-16 }
 0x30c   : > { %2920 = vrsqrt.f32 %v1762_v52 }
 0x30d   : > { %v1688_v37 = vpop.xlane.xlu0 %1687  ;;  %2922 = vrsqrt.f32 %v1761_v55 }
 0x30e   : > { %v1691_v42 = vpop.xlane.xlu1 %1690  ;;  %v1764_v0 = vmax.f32 %v1688_v37, 1e-16  ;;  %v2915_v4 = vpop.eup %2914 }
 0x30f   : > { %v1765_v16 = vmax.f32 %v1691_v42, 1e-16 }
 0x310   : > { %2924 = vrsqrt.f32 %v1764_v0 }
 0x311   : > { %v1694_v40 = vpop.xlane.xlu0 %1693  ;;  %2926 = vrsqrt.f32 %v1763_v5 }
 0x312   : > { %v3525_v46 = vpop.xlane.xlu1 %1696  ;;  %v2917_v11 = vpop.eup %2916  ;;  %v1766_v12 = vmax.f32 %v1694_v40, 1e-16 }
 0x313   : > { %v2919_v15 = vpop.eup %2918  ;;  %v1767_v24 = vmax.f32 %v3525_v46, 1e-16 }
 0x314   : > { %2928 = vrsqrt.f32 %v1766_v12 }
 0x315   : > { %v3523_v45 = vpop.xlane.xlu0 %1699  ;;  %2930 = vrsqrt.f32 %v1765_v16 }
 0x316   : > { %v3529_v50 = vpop.xlane.xlu1 %1702  ;;  %v1768_v22 = vmax.f32 %v3523_v45, 1e-16  ;;  %v2921_v25 = vpop.eup %2920 }
 0x317   : > { %v2923_v27 = vpop.eup %2922  ;;  %v1769_v32 = vmax.f32 %v3529_v50, 1e-16 }
 0x318   : > { %2932 = vrsqrt.f32 %v1768_v22 }
 0x319   : > { %v3527_v49 = vpop.xlane.xlu0 %1705  ;;  %2934 = vrsqrt.f32 %v1767_v24 }
 0x31a   : > { %v3541_v6 = vpop.xlane.xlu1 %1708  ;;  %v1770_v30 = vmax.f32 %v3527_v49, 1e-16  ;;  %v2925_v34 = vpop.eup %2924 }
 0x31b   : > { %v2927_v37 = vpop.eup %2926  ;;  %v1771_v42 = vmax.f32 %v3541_v6, 1e-16 }
 0x31c   : > { %2936 = vrsqrt.f32 %v1770_v30 }
 0x31d   : > { %v3537_v1 = vpop.xlane.xlu0 %1711  ;;  %2938 = vrsqrt.f32 %v1769_v32 }
 0x31e   : > { %v1772_v40 = vmax.f32 %v3537_v1, 1e-16  ;;  %v2929_v44 = vpop.eup %2928 }
 0x31f   : > { %v3557_v21 = vpop.xlane.xlu1 %1714  ;;  %v2931_v48 = vpop.eup %2930 }
 0x320   : > { %2940 = vrsqrt.f32 %v1772_v40 }
 0x321   : > { %v3553_v19 = vpop.xlane.xlu0 %1717  ;;  %2942 = vrsqrt.f32 %v1771_v42 }
 0x322   : > { %v2933_v55 = vpop.eup %2932 }
 0x323   : > { %v1721_v59 = vpop.xlane.xlu1 %1720  ;;  %v2935_v0 = vpop.eup %2934 }
 0x325   : > { %v1724_v61 = vpop.xlane.xlu0 %1723 }
 0x326   : > { %v1776_v5 = vmax.f32 %v1724_v61, 1e-16 }
 0x327   : > { %v1727_v49 = vpop.xlane.xlu1 %1726 }
 0x328   : > { %v1777_v22 = vmax.f32 %v1727_v49, 1e-16 }
 0x329   : > { %v1730_v45 = vpop.xlane.xlu0 %1729 }
 0x32b   : > { %v1733_v6 = vpop.xlane.xlu1 %1732 }
 0x33c   : > { %v2636_v53 = vpop.f32.mrb[16].mxu0 }
 0x33d   : > { %v3531_v56 = vmul.f32 %v2909_v51, %v2636_v53  ;;  %v1468_v57 = vpop.f32.mrb[17].mxu0  ;;  %v1774_v53 = vmax.f32 %v3553_v19, 1e-16  ;;  %v1778_v19 = vmax.f32 %v1730_v45, 1e-16 }
 0x33e   : > { %v3533_v58 = vmul.f32 %v2911_v54, %v1468_v57  ;;  %v1773_v57 = vmax.f32 %v3557_v21, 1e-16 }
 0x33f   : > { %v1855_v62 = vsel %vm1851_vm4, %v3531_v56, -inf  ;;  %2944 = vrsqrt.f32 %v1774_v53 }
 0x340   : > { %v2639_v2 = vpop.f32.mrb[18].mxu0  ;;  %1856 = vmax.xlane.f32.xlu0 %v1855_v62  ;;  %v1852_v3 = vsel %vm1851_vm4, %v3533_v58, -inf  ;;  %2946 = vrsqrt.f32 %v1773_v57 }
 0x341   : > { %v3543_v7 = vmul.f32 %v2913_v63, %v2639_v2  ;;  %v1478_v8 = vpop.f32.mrb[19].mxu0  ;;  %1853 = vmax.xlane.f32.xlu1 %v1852_v3  ;;  %v1736_v3 = vpop.xlane.xlu0 %1735  ;;  %2948 = vrsqrt.f32 %v1776_v5 }
 0x342   : > { %v3545_v9 = vmul.f32 %v2915_v4, %v1478_v8  ;;  %v1780_v32 = vmax.f32 %v1736_v3, 1e-16 }
 0x343   : > { %v1861_v10 = vsel %vm1851_vm4, %v3543_v7, -inf }
 0x344   : > { %v2642_v13 = vpop.f32.mrb[20].mxu0  ;;  %1862 = vmax.xlane.f32.xlu0 %v1861_v10  ;;  %v1858_v14 = vsel %vm1851_vm4, %v3545_v9, -inf  ;;  %v2937_v10 = vpop.eup %2936 }
 0x345   : > { %v3551_v17 = vmul.f32 %v2917_v11, %v2642_v13  ;;  %v1488_v18 = vpop.f32.mrb[21].mxu0  ;;  %1859 = vmax.xlane.f32.xlu1 %v1858_v14  ;;  %v1775_v11 = vmax.f32 %v1721_v59, 1e-16  ;;  %v2939_v14 = vpop.eup %2938 }
 0x346   : > { %v3555_v20 = vmul.f32 %v2919_v15, %v1488_v18 }
 0x347   : > { %v1867_v60 = vsel %vm1851_vm4, %v3551_v17, -inf  ;;  %2950 = vrsqrt.f32 %v1775_v11 }
 0x348   : > { %1868 = vmax.xlane.f32.xlu0 %v1867_v60  ;;  %v1864_v23 = vsel %vm1851_vm4, %v3555_v20, -inf  ;;  %v2941_v60 = vpop.eup %2940  ;;  %2952 = vrsqrt.f32 %v1778_v19 }
 0x349   : > { %1865 = vmax.xlane.f32.xlu1 %v1864_v23  ;;  %v1742_v23 = vpop.xlane.xlu0 %1741  ;;  %2954 = vrsqrt.f32 %v1777_v22 }
 0x34a   : > { %v2645_v26 = vpop.f32.mrb[22].mxu0  ;;  %2956 = vrsqrt.f32 %v1780_v32 }
 0x34b   : > { %v3565_v28 = vmul.f32 %v2921_v25, %v2645_v26  ;;  %v1498_v29 = vpop.f32.mrb[23].mxu0  ;;  %v2943_v26 = vpop.eup %2942 }
 0x34c   : > { %v3568_v31 = vmul.f32 %v2923_v27, %v1498_v29  ;;  %v1739_v27 = vpop.xlane.xlu1 %1738 }
 0x34d   : > { %v1873_v33 = vsel %vm1851_vm4, %v3565_v28, -inf }
 0x34e   : > { %v2648_v35 = vpop.f32.mrb[24].mxu0  ;;  %1874 = vmax.xlane.f32.xlu0 %v1873_v33  ;;  %v1870_v36 = vsel %vm1851_vm4, %v3568_v31, -inf  ;;  %v1779_v33 = vmax.f32 %v1733_v6, 1e-16 }
 0x34f   : > { %v3575_v38 = vmul.f32 %v2925_v34, %v2648_v35  ;;  %v1508_v39 = vpop.f32.mrb[25].mxu0  ;;  %1871 = vmax.xlane.f32.xlu1 %v1870_v36  ;;  %v2945_v35 = vpop.eup %2944 }
 0x350   : > { %v3578_v41 = vmul.f32 %v2927_v37, %v1508_v39  ;;  %v2947_v37 = vpop.eup %2946  ;;  %v1748_v39 = vpop.xlane.xlu0 %1747  ;;  %2958 = vrsqrt.f32 %v1779_v33 }
 0x351   : > { %v1879_v43 = vsel %vm1851_vm4, %v3575_v38, -inf  ;;  %v1784_v57 = vmax.f32 %v1748_v39, 1e-16 }
 0x352   : > { %v2651_v46 = vpop.f32.mrb[26].mxu0  ;;  %1880 = vmax.xlane.f32.xlu0 %v1879_v43  ;;  %v1876_v47 = vsel %vm1851_vm4, %v3578_v41, -inf  ;;  %v1745_v43 = vpop.xlane.xlu1 %1744 }
 0x353   : > { %v3585_v50 = vmul.f32 %v2929_v44, %v2651_v46  ;;  %v1518_v51 = vpop.f32.mrb[27].mxu0  ;;  %1877 = vmax.xlane.f32.xlu1 %v1876_v47  ;;  %v1782_v44 = vmax.f32 %v1742_v23, 1e-16  ;;  %v1781_v46 = vmax.f32 %v1739_v27, 1e-16 }
 0x354   : > { %v3587_v52 = vmul.f32 %v2931_v48, %v1518_v51  ;;  %v2949_v48 = vpop.eup %2948 }
 0x355   : > { %v1885_v54 = vsel %vm1851_vm4, %v3585_v50, -inf  ;;  %v2951_v53 = vpop.eup %2950  ;;  %2960 = vrsqrt.f32 %v1782_v44 }
 0x356   : > { %v2654_v62 = vpop.f32.mrb[28].mxu0  ;;  %1886 = vmax.xlane.f32.xlu0 %v1885_v54  ;;  %v1882_v63 = vsel %vm1851_vm4, %v3587_v52, -inf  ;;  %2962 = vrsqrt.f32 %v1781_v46  ;;  %v2953_v3 = vpop.eup %2952 }
 0x357   : > { %v3595_v1 = vmul.f32 %v2933_v55, %v2654_v62  ;;  %v1528_v2 = vpop.f32.mrb[29].mxu0  ;;  %1883 = vmax.xlane.f32.xlu1 %v1882_v63  ;;  %v1783_v63 = vmax.f32 %v1745_v43, 1e-16  ;;  %v1751_v5 = vpop.xlane.xlu1 %1750  ;;  %2964 = vrsqrt.f32 %v1784_v57 }
 0x358   : > { %v3597_v4 = vmul.f32 %v2935_v0, %v1528_v2  ;;  %v1754_v0 = vpop.xlane.xlu0 %1753 }
 0x359   : > { %v1891_v8 = vsel %vm1851_vm4, %v3595_v1, -inf  ;;  %2966 = vrsqrt.f32 %v1783_v63 }
 0x35a   : > { %v2657_v12 = vpop.f32.mrb[30].mxu0  ;;  %1892 = vmax.xlane.f32.xlu0 %v1891_v8  ;;  %v1888_v13 = vsel %vm1851_vm4, %v3597_v4, -inf }
 0x35b   : > { %v3603_v15 = vmul.f32 %v2937_v10, %v2657_v12  ;;  %v1538_v16 = vpop.f32.mrb[31].mxu0  ;;  %1889 = vmax.xlane.f32.xlu1 %v1888_v13  ;;  %v2955_v10 = vpop.eup %2954  ;;  %v1786_v13 = vmax.f32 %v1754_v0, 1e-16 }
 0x35c   : > { %v3605_v18 = vmul.f32 %v2939_v14, %v1538_v16  ;;  %v1785_v16 = vmax.f32 %v1751_v5, 1e-16 }
 0x35d   : > { %v1897_v21 = vsel %vm1851_vm4, %v3603_v15, -inf  ;;  %2968 = vrsqrt.f32 %v1786_v13 }
 0x35e   : > { %v2660_v24 = vpop.f32.mrb[32].mxu0  ;;  %1898 = vmax.xlane.f32.xlu0 %v1897_v21  ;;  %v1894_v25 = vsel %vm1851_vm4, %v3605_v18, -inf  ;;  %v2957_v21 = vpop.eup %2956  ;;  %2970 = vrsqrt.f32 %v1785_v16 }
 0x35f   : > { %v3611_v29 = vmul.f32 %v2941_v60, %v2660_v24  ;;  %v1548_v30 = vpop.f32.mrb[33].mxu0  ;;  %1895 = vmax.xlane.f32.xlu1 %v1894_v25  ;;  %v2959_v23 = vpop.eup %2958 }
 0x360   : > { %v3613_v61 = vmul.f32 %v2943_v26, %v1548_v30  ;;  %v2961_v30 = vpop.eup %2960 }
 0x361   : > { %v1903_v59 = vsel %vm1851_vm4, %v3611_v29, -inf  ;;  %v2963_v33 = vpop.eup %2962 }
 0x362   : > { %1904 = vmax.xlane.f32.xlu0 %v1903_v59  ;;  %v1900_v34 = vsel %vm1851_vm4, %v3613_v61, -inf  ;;  %v2965_v39 = vpop.eup %2964 }
 0x363   : > { %v2663_v36 = vpop.f32.mrb[34].mxu0  ;;  %1901 = vmax.xlane.f32.xlu1 %v1900_v34  ;;  %v2967_v44 = vpop.eup %2966 }
 0x364   : > { %v3619_v40 = vmul.f32 %v2945_v35, %v2663_v36  ;;  %v1558_v42 = vpop.f32.mrb[35].mxu0 }
 0x365   : > { %v3621_v45 = vmul.f32 %v2947_v37, %v1558_v42 }
 0x366   : > { %v1909_v47 = vsel %vm1851_vm4, %v3619_v40, -inf }
 0x367   : > { %v2666_v49 = vpop.f32.mrb[36].mxu0  ;;  %1910 = vmax.xlane.f32.xlu0 %v1909_v47  ;;  %v1906_v51 = vsel %vm1851_vm4, %v3621_v45, -inf }
 0x368   : > { %v3627_v54 = vmul.f32 %v2949_v48, %v2666_v49  ;;  %v1568_v55 = vpop.f32.mrb[37].mxu0  ;;  %1907 = vmax.xlane.f32.xlu1 %v1906_v51  ;;  %v2969_v51 = vpop.eup %2968 }
 0x369   : > { %v3629_v62 = vmul.f32 %v2951_v53, %v1568_v55  ;;  %v2971_v57 = vpop.eup %2970 }
 0x36a   : > { %v1915_v2 = vsel %vm1851_vm4, %v3627_v54, -inf }
 0x36b   : > { %v2669_v6 = vpop.f32.mrb[38].mxu0  ;;  %1916 = vmax.xlane.f32.xlu0 %v1915_v2  ;;  %v1912_v8 = vsel %vm1851_vm4, %v3629_v62, -inf }
 0x36c   : > { %v3635_v11 = vmul.f32 %v2953_v3, %v2669_v6  ;;  %v1578_v12 = vpop.f32.mrb[39].mxu0  ;;  %1913 = vmax.xlane.f32.xlu1 %v1912_v8 }
 0x36d   : > { %v3637_v14 = vmul.f32 %v2955_v10, %v1578_v12 }
 0x36e   : > { %v1921_v19 = vsel %vm1851_vm4, %v3635_v11, -inf }
 0x36f   : > { %v2672_v60 = vpop.f32.mrb[40].mxu0  ;;  %1922 = vmax.xlane.f32.xlu0 %v1921_v19  ;;  %v1918_v22 = vsel %vm1851_vm4, %v3637_v14, -inf }
 0x370   : > { %v3643_v24 = vmul.f32 %v2957_v21, %v2672_v60  ;;  %v1588_v25 = vpop.f32.mrb[41].mxu0  ;;  %1919 = vmax.xlane.f32.xlu1 %v1918_v22 }
 0x371   : > { %v3645_v26 = vmul.f32 %v2959_v23, %v1588_v25 }
 0x372   : > { %v1927_v27 = vsel %vm1851_vm4, %v3643_v24, -inf }
 0x373   : > { %v2675_v32 = vpop.f32.mrb[42].mxu0  ;;  %1928 = vmax.xlane.f32.xlu0 %v1927_v27  ;;  %v1924_v59 = vsel %vm1851_vm4, %v3645_v26, -inf }
 0x374   : > { %v3651_v34 = vmul.f32 %v2961_v30, %v2675_v32  ;;  %v1598_v35 = vpop.f32.mrb[43].mxu0  ;;  %1925 = vmax.xlane.f32.xlu1 %v1924_v59 }
 0x375   : > { %v3653_v36 = vmul.f32 %v2963_v33, %v1598_v35 }
 0x376   : > { %v1933_v37 = vsel %vm1851_vm4, %v3651_v34, -inf }
 0x377   : > { %v2678_v42 = vpop.f32.mrb[44].mxu0  ;;  %1934 = vmax.xlane.f32.xlu0 %v1933_v37  ;;  %v1930_v43 = vsel %vm1851_vm4, %v3653_v36, -inf }
 0x378   : > { %v3659_v46 = vmul.f32 %v2965_v39, %v2678_v42  ;;  %v1608_v47 = vpop.f32.mrb[45].mxu0  ;;  %1931 = vmax.xlane.f32.xlu1 %v1930_v43 }
 0x379   : > { %v3661_v48 = vmul.f32 %v2967_v44, %v1608_v47 }
 0x37a   : > { %v1939_v49 = vsel %vm1851_vm4, %v3659_v46, -inf }
 0x37b   : > { %1940 = vmax.xlane.f32.xlu0 %v1939_v49  ;;  %v2681_v53 = vpop.f32.mrb[46].mxu0  ;;  %v1936_v55 = vsel %vm1851_vm4, %v3661_v48, -inf }
 0x37c   : > { %v3667_v63 = vmul.f32 %v2969_v51, %v2681_v53  ;;  %1937 = vmax.xlane.f32.xlu1 %v1936_v55  ;;  %v1618_v0 = vpop.f32.mrb[47].mxu0 }
 0x37d   : > { %v3669_v2 = vmul.f32 %v2971_v57, %v1618_v0 }
 0x37e   : > { %v1945_v3 = vsel %vm1851_vm4, %v3667_v63, -inf }
 0x37f   : > { %1946 = vmax.xlane.f32.xlu0 %v1945_v3  ;;  %v1942_v5 = vsel %vm1851_vm4, %v3669_v2, -inf }
 0x380   : > { %1943 = vmax.xlane.f32.xlu1 %v1942_v5 }
 0x3cd   : > { %v1857_v6 = vpop.xlane.xlu0 %1856 }
 0x3ce   : > { %v1949_v8 = vsub.f32 %v3531_v56, %v1857_v6  ;;  %v1854_v10 = vpop.xlane.xlu1 %1853 }
 0x3cf   : > { %v1948_v12 = vsub.f32 %v3533_v58, %v1854_v10 }
 0x3d0   : > { %v1982_v13 = vmul.f32 1.442695, %v1949_v8 }
 0x3d1   : > { %v1980_v16 = vmul.f32 1.442695, %v1948_v12  ;;  %v1863_v19 = vpop.xlane.xlu0 %1862 }
 0x3d2   : > { %2972 = vpow2.f32 %v1982_v13  ;;  %v1951_v21 = vsub.f32 %v3543_v7, %v1863_v19  ;;  %v1860_v60 = vpop.xlane.xlu1 %1859 }
 0x3d3   : > { %2974 = vpow2.f32 %v1980_v16  ;;  %v1950_v22 = vsub.f32 %v3545_v9, %v1860_v60 }
 0x3d4   : > { %v1986_v23 = vmul.f32 1.442695, %v1951_v21 }
 0x3d5   : > { %v1984_v25 = vmul.f32 1.442695, %v1950_v22  ;;  %v1869_v27 = vpop.xlane.xlu0 %1868 }
 0x3d6   : > { %2976 = vpow2.f32 %v1986_v23  ;;  %v1953_v30 = vsub.f32 %v3551_v17, %v1869_v27  ;;  %v1866_v56 = vpop.xlane.xlu1 %1865 }
 0x3d7   : > { %2978 = vpow2.f32 %v1984_v25  ;;  %v1952_v58 = vsub.f32 %v3555_v20, %v1866_v56 }
 0x3d8   : > { %v1990_v32 = vmul.f32 1.442695, %v1953_v30 }
 0x3d9   : > { %v1988_v59 = vmul.f32 1.442695, %v1952_v58 }
 0x3da   : > { %2980 = vpow2.f32 %v1990_v32 }
 0x3db   : > { %2982 = vpow2.f32 %v1988_v59  ;;  %v1875_v33 = vpop.xlane.xlu0 %1874 }
 0x3dc   : > { %v3681_v7 = vpop.eup %2972  ;;  %v1955_v35 = vsub.f32 %v3565_v28, %v1875_v33  ;;  %v1872_v9 = vpop.xlane.xlu1 %1871 }
 0x3dd   : > { %v3684_v37 = vpop.eup %2974  ;;  %v1954_v39 = vsub.f32 %v3568_v31, %v1872_v9  ;;  %v2047_v17 = vsel %vm1851_vm4, %v3681_v7, 0.0 }
 0x3de   : > { %v1994_v42 = vmul.f32 1.442695, %v1955_v35  ;;  %2048 = vadd.xlane.f32.xlu0 %v2047_v17  ;;  %v2044_v20 = vsel %vm1851_vm4, %v3684_v37, 0.0 }
 0x3df   : > { %v1992_v43 = vmul.f32 1.442695, %v1954_v39  ;;  %v1881_v44 = vpop.xlane.xlu0 %1880  ;;  %2045 = vadd.xlane.f32.xlu1 %v2044_v20 }
 0x3e0   : > { %v3691_v47 = vpop.eup %2976  ;;  %2984 = vpow2.f32 %v1994_v42  ;;  %v1957_v28 = vsub.f32 %v3575_v38, %v1881_v44  ;;  %v1878_v49 = vpop.xlane.xlu1 %1877 }
 0x3e1   : > { %v3694_v51 = vpop.eup %2978  ;;  %2986 = vpow2.f32 %v1992_v43  ;;  %v1956_v31 = vsub.f32 %v3578_v41, %v1878_v49  ;;  %v2053_v53 = vsel %vm1851_vm4, %v3691_v47, 0.0 }
 0x3e2   : > { %v1998_v55 = vmul.f32 1.442695, %v1957_v28  ;;  %2054 = vadd.xlane.f32.xlu0 %v2053_v53  ;;  %v2050_v57 = vsel %vm1851_vm4, %v3694_v51, 0.0 }
 0x3e3   : > { %v1996_v0 = vmul.f32 1.442695, %v1956_v31  ;;  %v1887_v3 = vpop.xlane.xlu0 %1886  ;;  %2051 = vadd.xlane.f32.xlu1 %v2050_v57 }
 0x3e4   : > { %v3701_v5 = vpop.eup %2980  ;;  %2988 = vpow2.f32 %v1998_v55  ;;  %v1959_v38 = vsub.f32 %v3585_v50, %v1887_v3  ;;  %v1884_v6 = vpop.xlane.xlu1 %1883 }
 0x3e5   : > { %v3704_v8 = vpop.eup %2982  ;;  %2990 = vpow2.f32 %v1996_v0  ;;  %v1958_v41 = vsub.f32 %v3587_v52, %v1884_v6  ;;  %v2059_v10 = vsel %vm1851_vm4, %v3701_v5, 0.0 }
 0x3e6   : > { %v2002_v12 = vmul.f32 1.442695, %v1959_v38  ;;  %2060 = vadd.xlane.f32.xlu0 %v2059_v10  ;;  %v2056_v13 = vsel %vm1851_vm4, %v3704_v8, 0.0 }
 0x3e7   : > { %v2000_v16 = vmul.f32 1.442695, %v1958_v41  ;;  %v1893_v19 = vpop.xlane.xlu0 %1892  ;;  %2057 = vadd.xlane.f32.xlu1 %v2056_v13 }
 0x3e8   : > { %2992 = vpow2.f32 %v2002_v12  ;;  %v1961_v50 = vsub.f32 %v3595_v1, %v1893_v19  ;;  %v1890_v21 = vpop.xlane.xlu1 %1889 }
 0x3e9   : > { %2994 = vpow2.f32 %v2000_v16  ;;  %v1960_v60 = vsub.f32 %v3597_v4, %v1890_v21 }
 0x3ea   : > { %v3713_v22 = vpop.eup %2984  ;;  %v2006_v52 = vmul.f32 1.442695, %v1961_v50 }
 0x3eb   : > { %v3715_v23 = vpop.eup %2986  ;;  %v2004_v25 = vmul.f32 1.442695, %v1960_v60  ;;  %v1899_v27 = vpop.xlane.xlu0 %1898  ;;  %v2065_v30 = vsel %vm1851_vm4, %v3713_v22, 0.0 }
 0x3ec   : > { %2996 = vpow2.f32 %v2006_v52  ;;  %v1963_v56 = vsub.f32 %v3603_v15, %v1899_v27  ;;  %v1896_v58 = vpop.xlane.xlu1 %1895  ;;  %2066 = vadd.xlane.f32.xlu0 %v2065_v30  ;;  %v2062_v1 = vsel %vm1851_vm4, %v3715_v23, 0.0 }
 0x3ed   : > { %2998 = vpow2.f32 %v2004_v25  ;;  %v1962_v4 = vsub.f32 %v3605_v18, %v1896_v58  ;;  %2063 = vadd.xlane.f32.xlu1 %v2062_v1 }
 0x3ee   : > { %v3723_v32 = vpop.eup %2988  ;;  %v2010_v59 = vmul.f32 1.442695, %v1963_v56 }
 0x3ef   : > { %v3725_v33 = vpop.eup %2990  ;;  %v2008_v35 = vmul.f32 1.442695, %v1962_v4  ;;  %v1905_v9 = vpop.xlane.xlu0 %1904  ;;  %v2071_v39 = vsel %vm1851_vm4, %v3723_v32, 0.0 }
 0x3f0   : > { %3000 = vpow2.f32 %v2010_v59  ;;  %v1965_v15 = vsub.f32 %v3611_v29, %v1905_v9  ;;  %v1902_v17 = vpop.xlane.xlu1 %1901  ;;  %2072 = vadd.xlane.f32.xlu0 %v2071_v39  ;;  %v2068_v42 = vsel %vm1851_vm4, %v3725_v33, 0.0 }
 0x3f1   : > { %3002 = vpow2.f32 %v2008_v35  ;;  %v1964_v18 = vsub.f32 %v3613_v61, %v1902_v17  ;;  %2069 = vadd.xlane.f32.xlu1 %v2068_v42 }
 0x3f2   : > { %v3733_v20 = vpop.eup %2992  ;;  %v2014_v43 = vmul.f32 1.442695, %v1965_v15 }
 0x3f3   : > { %v3735_v44 = vpop.eup %2994  ;;  %v2012_v28 = vmul.f32 1.442695, %v1964_v18  ;;  %v2077_v49 = vsel %vm1851_vm4, %v3733_v20, 0.0 }
 0x3f4   : > { %3004 = vpow2.f32 %v2014_v43  ;;  %v1911_v29 = vpop.xlane.xlu0 %1910  ;;  %2078 = vadd.xlane.f32.xlu0 %v2077_v49  ;;  %v2074_v31 = vsel %vm1851_vm4, %v3735_v44, 0.0 }
 0x3f5   : > { %3006 = vpow2.f32 %v2012_v28  ;;  %v1967_v53 = vsub.f32 %v3619_v40, %v1911_v29  ;;  %v1908_v61 = vpop.xlane.xlu1 %1907  ;;  %2075 = vadd.xlane.f32.xlu1 %v2074_v31 }
 0x3f6   : > { %v3742_v55 = vpop.eup %2996  ;;  %v1966_v57 = vsub.f32 %v3621_v45, %v1908_v61 }
 0x3f7   : > { %v3745_v0 = vpop.eup %2998  ;;  %v2018_v3 = vmul.f32 1.442695, %v1967_v53  ;;  %v2083_v38 = vsel %vm1851_vm4, %v3742_v55, 0.0 }
 0x3f8   : > { %v2016_v6 = vmul.f32 1.442695, %v1966_v57  ;;  %v1917_v41 = vpop.xlane.xlu0 %1916  ;;  %2084 = vadd.xlane.f32.xlu0 %v2083_v38  ;;  %v2080_v10 = vsel %vm1851_vm4, %v3745_v0, 0.0 }
 0x3f9   : > { %3008 = vpow2.f32 %v2018_v3  ;;  %v1969_v40 = vsub.f32 %v3627_v54, %v1917_v41  ;;  %v1914_v12 = vpop.xlane.xlu1 %1913  ;;  %2081 = vadd.xlane.f32.xlu1 %v2080_v10 }
 0x3fa   : > { %v3752_v13 = vpop.eup %3000  ;;  %3010 = vpow2.f32 %v2016_v6  ;;  %v1968_v45 = vsub.f32 %v3629_v62, %v1914_v12 }
 0x3fb   : > { %v3755_v16 = vpop.eup %3002  ;;  %v2022_v19 = vmul.f32 1.442695, %v1969_v40  ;;  %v2089_v50 = vsel %vm1851_vm4, %v3752_v13, 0.0 }
 0x3fc   : > { %v2020_v21 = vmul.f32 1.442695, %v1968_v45  ;;  %v1923_v60 = vpop.xlane.xlu0 %1922  ;;  %2090 = vadd.xlane.f32.xlu0 %v2089_v50  ;;  %v2086_v52 = vsel %vm1851_vm4, %v3755_v16, 0.0 }
 0x3fd   : > { %3012 = vpow2.f32 %v2022_v19  ;;  %v1971_v54 = vsub.f32 %v3635_v11, %v1923_v60  ;;  %v1920_v25 = vpop.xlane.xlu1 %1919  ;;  %2087 = vadd.xlane.f32.xlu1 %v2086_v52 }
 0x3fe   : > { %v3762_v27 = vpop.eup %3004  ;;  %3014 = vpow2.f32 %v2020_v21  ;;  %v1970_v62 = vsub.f32 %v3637_v14, %v1920_v25 }
 0x3ff   : > { %v3765_v30 = vpop.eup %3006  ;;  %v2026_v56 = vmul.f32 1.442695, %v1971_v54  ;;  %v2095_v58 = vsel %vm1851_vm4, %v3762_v27, 0.0 }
 0x400   : > { %v2024_v1 = vmul.f32 1.442695, %v1970_v62  ;;  %v1929_v4 = vpop.xlane.xlu0 %1928  ;;  %2096 = vadd.xlane.f32.xlu0 %v2095_v58  ;;  %v2092_v59 = vsel %vm1851_vm4, %v3765_v30, 0.0 }
 0x401   : > { %3016 = vpow2.f32 %v2026_v56  ;;  %v1973_v11 = vsub.f32 %v3643_v24, %v1929_v4  ;;  %v1926_v35 = vpop.xlane.xlu1 %1925  ;;  %2093 = vadd.xlane.f32.xlu1 %v2092_v59 }
 0x402   : > { %3018 = vpow2.f32 %v2024_v1  ;;  %v1972_v14 = vsub.f32 %v3645_v26, %v1926_v35 }
 0x403   : > { %v3773_v9 = vpop.eup %3008  ;;  %v2030_v39 = vmul.f32 1.442695, %v1973_v11 }
 0x404   : > { %v3775_v15 = vpop.eup %3010  ;;  %v2028_v17 = vmul.f32 1.442695, %v1972_v14  ;;  %v1935_v42 = vpop.xlane.xlu0 %1934  ;;  %v2101_v18 = vsel %vm1851_vm4, %v3773_v9, 0.0 }
 0x405   : > { %3020 = vpow2.f32 %v2030_v39  ;;  %v1975_v43 = vsub.f32 %v3651_v34, %v1935_v42  ;;  %v1932_v28 = vpop.xlane.xlu1 %1931  ;;  %2102 = vadd.xlane.f32.xlu0 %v2101_v18  ;;  %v2098_v24 = vsel %vm1851_vm4, %v3775_v15, 0.0 }
 0x406   : > { %3022 = vpow2.f32 %v2028_v17  ;;  %v1974_v26 = vsub.f32 %v3653_v36, %v1932_v28  ;;  %2099 = vadd.xlane.f32.xlu1 %v2098_v24 }
 0x407   : > { %v3783_v49 = vpop.eup %3012  ;;  %v2034_v29 = vmul.f32 1.442695, %v1975_v43 }
 0x408   : > { %v3785_v31 = vpop.eup %3014  ;;  %v2032_v53 = vmul.f32 1.442695, %v1974_v26  ;;  %v1941_v61 = vpop.xlane.xlu0 %1940  ;;  %v2107_v57 = vsel %vm1851_vm4, %v3783_v49, 0.0 }
 0x409   : > { %3024 = vpow2.f32 %v2034_v29  ;;  %v1977_v34 = vsub.f32 %v3659_v46, %v1941_v61  ;;  %v1938_v3 = vpop.xlane.xlu1 %1937  ;;  %2108 = vadd.xlane.f32.xlu0 %v2107_v57  ;;  %v2104_v38 = vsel %vm1851_vm4, %v3785_v31, 0.0 }
 0x40a   : > { %3026 = vpow2.f32 %v2032_v53  ;;  %v1976_v36 = vsub.f32 %v3661_v48, %v1938_v3  ;;  %2105 = vadd.xlane.f32.xlu1 %v2104_v38 }
 0x40b   : > { %v3793_v6 = vpop.eup %3016  ;;  %v2038_v41 = vmul.f32 1.442695, %v1977_v34 }
 0x40c   : > { %v3795_v10 = vpop.eup %3018  ;;  %v2036_v40 = vmul.f32 1.442695, %v1976_v36  ;;  %v1947_v12 = vpop.xlane.xlu0 %1946  ;;  %v2113_v45 = vsel %vm1851_vm4, %v3793_v6, 0.0 }
 0x40d   : > { %3028 = vpow2.f32 %v2038_v41  ;;  %v1979_v46 = vsub.f32 %v3667_v63, %v1947_v12  ;;  %2114 = vadd.xlane.f32.xlu0 %v2113_v45  ;;  %v1944_v19 = vpop.xlane.xlu1 %1943  ;;  %v2110_v50 = vsel %vm1851_vm4, %v3795_v10, 0.0 }
 0x40e   : > { %3030 = vpow2.f32 %v2036_v40  ;;  %v1978_v48 = vsub.f32 %v3669_v2, %v1944_v19  ;;  %2111 = vadd.xlane.f32.xlu1 %v2110_v50 }
 0x40f   : > { %v3803_v21 = vpop.eup %3020  ;;  %v2042_v60 = vmul.f32 1.442695, %v1979_v46 }
 0x410   : > { %v3805_v52 = vpop.eup %3022  ;;  %v2040_v54 = vmul.f32 1.442695, %v1978_v48  ;;  %v2119_v25 = vsel %vm1851_vm4, %v3803_v21, 0.0 }
 0x411   : > { %3032 = vpow2.f32 %v2042_v60  ;;  %2120 = vadd.xlane.f32.xlu0 %v2119_v25  ;;  %v2116_v63 = vsel %vm1851_vm4, %v3805_v52, 0.0 }
 0x412   : > { %3034 = vpow2.f32 %v2040_v54  ;;  %2117 = vadd.xlane.f32.xlu1 %v2116_v63 }
 0x413   : > { %v3811_v62 = vpop.eup %3024 }
 0x414   : > { %v3813_v2 = vpop.eup %3026  ;;  %v2125_v56 = vsel %vm1851_vm4, %v3811_v62, 0.0 }
 0x415   : > { %2126 = vadd.xlane.f32.xlu0 %v2125_v56  ;;  %v2122_v58 = vsel %vm1851_vm4, %v3813_v2, 0.0 }
 0x416   : > { %2123 = vadd.xlane.f32.xlu1 %v2122_v58 }
 0x417   : > { %v3819_v1 = vpop.eup %3028 }
 0x418   : > { %v3821_v4 = vpop.eup %3030  ;;  %v2131_v59 = vsel %vm1851_vm4, %v3819_v1, 0.0 }
 0x419   : > { %2132 = vadd.xlane.f32.xlu0 %v2131_v59  ;;  %v2128_v11 = vsel %vm1851_vm4, %v3821_v4, 0.0 }
 0x41a   : > { %2129 = vadd.xlane.f32.xlu1 %v2128_v11 }
 0x41b   : > { %v3827_v35 = vpop.eup %3032 }
 0x41c   : > { %v3829_v14 = vpop.eup %3034  ;;  %v2137_v39 = vsel %vm1851_vm4, %v3827_v35, 0.0 }
 0x41d   : > { %2138 = vadd.xlane.f32.xlu0 %v2137_v39  ;;  %v2134_v17 = vsel %vm1851_vm4, %v3829_v14, 0.0 }
 0x41e   : > { %2135 = vadd.xlane.f32.xlu1 %v2134_v17 }
 0x46b   : > { %v2049_v42 = vpop.xlane.xlu0 %2048 }
 0x46c   : > { %3036 = vrcp.f32 %v2049_v42  ;;  %v2046_v18 = vpop.xlane.xlu1 %2045 }
 0x46d   : > { %3038 = vrcp.f32 %v2046_v18 }
 0x46f   : > { %v2055_v43 = vpop.xlane.xlu0 %2054 }
 0x470   : > { %3040 = vrcp.f32 %v2055_v43  ;;  %v2052_v28 = vpop.xlane.xlu1 %2051 }
 0x471   : > { %3042 = vrcp.f32 %v2052_v28 }
 0x473   : > { %v2061_v24 = vpop.xlane.xlu0 %2060 }
 0x474   : > { %3044 = vrcp.f32 %v2061_v24  ;;  %v2058_v26 = vpop.xlane.xlu1 %2057 }
 0x475   : > { %3046 = vrcp.f32 %v2058_v26 }
 0x476   : > { %v3037_v29 = vpop.eup %3036 }
 0x477   : > { %v3039_v53 = vpop.eup %3038  ;;  %v2143_v61 = vmul.f32 %v3037_v29, %v3681_v7 }
 0x478   : > { %v2141_v57 = vmul.f32 %v3039_v53, %v3684_v37 }
 0x479   : > { %2205 = vst.msk [vmem:[%s3840_s13 + $0x8] sm:$0xff] %vm1851_vm4, %v2143_v61  ;;  %v2067_v34 = vpop.xlane.xlu0 %2066 }
 0x47a   : > { %v3041_v3 = vpop.eup %3040  ;;  %2204 = vst.msk [vmem:[%s3840_s13] sm:$0xff] %vm1851_vm4, %v2141_v57  ;;  %3048 = vrcp.f32 %v2067_v34  ;;  %v2064_v38 = vpop.xlane.xlu1 %2063 }
 0x47b   : > { %v3043_v36 = vpop.eup %3042  ;;  %v2147_v41 = vmul.f32 %v3041_v3, %v3691_v47  ;;  %3050 = vrcp.f32 %v2064_v38 }
 0x47c   : > { %v2145_v40 = vmul.f32 %v3043_v36, %v3694_v51 }
 0x47d   : > { %2207 = vst.msk [vmem:[%s3840_s13 + $0x18] sm:$0xff] %vm1851_vm4, %v2147_v41  ;;  %v2073_v7 = vpop.xlane.xlu0 %2072 }
 0x47e   : > { %v3045_v37 = vpop.eup %3044  ;;  %2206 = vst.msk [vmem:[%s3840_s13 + $0x10] sm:$0xff] %vm1851_vm4, %v2145_v40  ;;  %3052 = vrcp.f32 %v2073_v7  ;;  %v2070_v12 = vpop.xlane.xlu1 %2069 }
 0x47f   : > { %v3047_v45 = vpop.eup %3046  ;;  %v2151_v46 = vmul.f32 %v3045_v37, %v3701_v5  ;;  %3054 = vrcp.f32 %v2070_v12 }
 0x480   : > { %v2149_v19 = vmul.f32 %v3047_v45, %v3704_v8 }
 0x481   : > { %2209 = vst.msk [vmem:[%s3840_s13 + $0x28] sm:$0xff] %vm1851_vm4, %v2151_v46  ;;  %v2079_v47 = vpop.xlane.xlu0 %2078 }
 0x482   : > { %2208 = vst.msk [vmem:[%s3840_s13 + $0x20] sm:$0xff] %vm1851_vm4, %v2149_v19  ;;  %3056 = vrcp.f32 %v2079_v47  ;;  %v2076_v51 = vpop.xlane.xlu1 %2075 }
 0x483   : > { %3058 = vrcp.f32 %v2076_v51 }
 0x484   : > { %v3049_v50 = vpop.eup %3048 }
 0x485   : > { %v3051_v48 = vpop.eup %3050  ;;  %v2155_v60 = vmul.f32 %v3049_v50, %v3713_v22  ;;  %v2085_v54 = vpop.xlane.xlu0 %2084 }
 0x486   : > { %v2153_v5 = vmul.f32 %v3051_v48, %v3715_v23  ;;  %3060 = vrcp.f32 %v2085_v54  ;;  %v2082_v8 = vpop.xlane.xlu1 %2081 }
 0x487   : > { %2211 = vst.msk [vmem:[%s3840_s13 + $0x38] sm:$0xff] %vm1851_vm4, %v2155_v60  ;;  %3062 = vrcp.f32 %v2082_v8 }
 0x488   : > { %v3053_v25 = vpop.eup %3052  ;;  %2210 = vst.msk [vmem:[%s3840_s13 + $0x30] sm:$0xff] %vm1851_vm4, %v2153_v5 }
 0x489   : > { %v3055_v63 = vpop.eup %3054  ;;  %v2159_v56 = vmul.f32 %v3053_v25, %v3723_v32  ;;  %v2091_v58 = vpop.xlane.xlu0 %2090 }
 0x48a   : > { %v2157_v59 = vmul.f32 %v3055_v63, %v3725_v33  ;;  %3064 = vrcp.f32 %v2091_v58  ;;  %v2088_v22 = vpop.xlane.xlu1 %2087 }
 0x48b   : > { %2213 = vst.msk [vmem:[%s3840_s13 + $0x48] sm:$0xff] %vm1851_vm4, %v2159_v56  ;;  %3066 = vrcp.f32 %v2088_v22 }
 0x48c   : > { %v3057_v23 = vpop.eup %3056  ;;  %2212 = vst.msk [vmem:[%s3840_s13 + $0x40] sm:$0xff] %vm1851_vm4, %v2157_v59 }
 0x48d   : > { %v3059_v11 = vpop.eup %3058  ;;  %v2163_v39 = vmul.f32 %v3057_v23, %v3733_v20  ;;  %v2097_v17 = vpop.xlane.xlu0 %2096 }
 0x48e   : > { %v2161_v32 = vmul.f32 %v3059_v11, %v3735_v44  ;;  %3068 = vrcp.f32 %v2097_v17  ;;  %v2094_v42 = vpop.xlane.xlu1 %2093 }
 0x48f   : > { %2215 = vst.msk [vmem:[%s3840_s13 + $0x58] sm:$0xff] %vm1851_vm4, %v2163_v39  ;;  %3070 = vrcp.f32 %v2094_v42 }
 0x490   : > { %v3061_v33 = vpop.eup %3060  ;;  %2214 = vst.msk [vmem:[%s3840_s13 + $0x50] sm:$0xff] %vm1851_vm4, %v2161_v32 }
 0x491   : > { %v3063_v18 = vpop.eup %3062  ;;  %v2167_v43 = vmul.f32 %v3061_v33, %v3742_v55 }
 0x492   : > { %v2165_v28 = vmul.f32 %v3063_v18, %v3745_v0  ;;  %v2103_v20 = vpop.xlane.xlu0 %2102 }
 0x493   : > { %2217 = vst.msk [vmem:[%s3840_s13 + $0x68] sm:$0xff] %vm1851_vm4, %v2167_v43  ;;  %3072 = vrcp.f32 %v2103_v20  ;;  %v2100_v44 = vpop.xlane.xlu1 %2099 }
 0x494   : > { %v3065_v24 = vpop.eup %3064  ;;  %2216 = vst.msk [vmem:[%s3840_s13 + $0x60] sm:$0xff] %vm1851_vm4, %v2165_v28  ;;  %3074 = vrcp.f32 %v2100_v44 }
 0x495   : > { %v3067_v26 = vpop.eup %3066  ;;  %v2171_v29 = vmul.f32 %v3065_v24, %v3752_v13 }
 0x496   : > { %v2169_v53 = vmul.f32 %v3067_v26, %v3755_v16  ;;  %v2109_v55 = vpop.xlane.xlu0 %2108 }
 0x497   : > { %2219 = vst.msk [vmem:[%s3840_s13 + $0x78] sm:$0xff] %vm1851_vm4, %v2171_v29  ;;  %3076 = vrcp.f32 %v2109_v55  ;;  %v2106_v0 = vpop.xlane.xlu1 %2105 }
 0x498   : > { %v3069_v61 = vpop.eup %3068  ;;  %2218 = vst.msk [vmem:[%s3840_s13 + $0x70] sm:$0xff] %vm1851_vm4, %v2169_v53  ;;  %3078 = vrcp.f32 %v2106_v0 }
 0x499   : > { %v3071_v57 = vpop.eup %3070  ;;  %v2175_v34 = vmul.f32 %v3069_v61, %v3762_v27 }
 0x49a   : > { %v2173_v3 = vmul.f32 %v3071_v57, %v3765_v30  ;;  %v2115_v38 = vpop.xlane.xlu0 %2114 }
 0x49b   : > { %2221 = vst.msk [vmem:[%s3840_s13 + $0x88] sm:$0xff] %vm1851_vm4, %v2175_v34  ;;  %3080 = vrcp.f32 %v2115_v38  ;;  %v2112_v13 = vpop.xlane.xlu1 %2111 }
 0x49c   : > { %2220 = vst.msk [vmem:[%s3840_s13 + $0x80] sm:$0xff] %vm1851_vm4, %v2173_v3  ;;  %3082 = vrcp.f32 %v2112_v13 }
 0x49d   : > { %v3073_v16 = vpop.eup %3072 }
 0x49e   : > { %v3075_v36 = vpop.eup %3074  ;;  %v2179_v41 = vmul.f32 %v3073_v16, %v3773_v9  ;;  %v2121_v40 = vpop.xlane.xlu0 %2120 }
 0x49f   : > { %v2177_v7 = vmul.f32 %v3075_v36, %v3775_v15  ;;  %3084 = vrcp.f32 %v2121_v40  ;;  %v2118_v27 = vpop.xlane.xlu1 %2117 }
 0x4a0   : > { %2223 = vst.msk [vmem:[%s3840_s13 + $0x98] sm:$0xff] %vm1851_vm4, %v2179_v41  ;;  %3086 = vrcp.f32 %v2118_v27 }
 0x4a1   : > { %v3077_v30 = vpop.eup %3076  ;;  %2222 = vst.msk [vmem:[%s3840_s13 + $0x90] sm:$0xff] %vm1851_vm4, %v2177_v7 }
 0x4a2   : > { %v3079_v37 = vpop.eup %3078  ;;  %v2183_v12 = vmul.f32 %v3077_v30, %v3783_v49  ;;  %v2127_v45 = vpop.xlane.xlu0 %2126 }
 0x4a3   : > { %v2181_v46 = vmul.f32 %v3079_v37, %v3785_v31  ;;  %3088 = vrcp.f32 %v2127_v45  ;;  %v2124_v9 = vpop.xlane.xlu1 %2123 }
 0x4a4   : > { %2225 = vst.msk [vmem:[%s3840_s13 + $0xa8] sm:$0xff] %vm1851_vm4, %v2183_v12  ;;  %3090 = vrcp.f32 %v2124_v9 }
 0x4a5   : > { %v3081_v15 = vpop.eup %3080  ;;  %2224 = vst.msk [vmem:[%s3840_s13 + $0xa0] sm:$0xff] %vm1851_vm4, %v2181_v46 }
 0x4a6   : > { %v3083_v19 = vpop.eup %3082  ;;  %v2187_v47 = vmul.f32 %v3081_v15, %v3793_v6  ;;  %v2133_v51 = vpop.xlane.xlu0 %2132 }
 0x4a7   : > { %v2185_v50 = vmul.f32 %v3083_v19, %v3795_v10  ;;  %3092 = vrcp.f32 %v2133_v51  ;;  %v2130_v49 = vpop.xlane.xlu1 %2129 }
 0x4a8   : > { %2227 = vst.msk [vmem:[%s3840_s13 + $0xb8] sm:$0xff] %vm1851_vm4, %v2187_v47  ;;  %3094 = vrcp.f32 %v2130_v49 }
 0x4a9   : > { %v3085_v31 = vpop.eup %3084  ;;  %2226 = vst.msk [vmem:[%s3840_s13 + $0xb0] sm:$0xff] %vm1851_vm4, %v2185_v50 }
 0x4aa   : > { %v3087_v48 = vpop.eup %3086  ;;  %v2191_v60 = vmul.f32 %v3085_v31, %v3803_v21  ;;  %v2139_v54 = vpop.xlane.xlu0 %2138 }
 0x4ab   : > { %v2189_v6 = vmul.f32 %v3087_v48, %v3805_v52  ;;  %3096 = vrcp.f32 %v2139_v54  ;;  %v2136_v10 = vpop.xlane.xlu1 %2135 }
 0x4ac   : > { %2229 = vst.msk [vmem:[%s3840_s13 + $0xc8] sm:$0xff] %vm1851_vm4, %v2191_v60  ;;  %3098 = vrcp.f32 %v2136_v10 }
 0x4ad   : > { %v3089_v5 = vpop.eup %3088  ;;  %2228 = vst.msk [vmem:[%s3840_s13 + $0xc0] sm:$0xff] %vm1851_vm4, %v2189_v6 }
 0x4ae   : > { %v3091_v8 = vpop.eup %3090  ;;  %v2195_v25 = vmul.f32 %v3089_v5, %v3811_v62 }
 0x4af   : > { %v2193_v21 = vmul.f32 %v3091_v8, %v3813_v2 }
 0x4b0   : > { %2231 = vst.msk [vmem:[%s3840_s13 + $0xd8] sm:$0xff] %vm1851_vm4, %v2195_v25 }
 0x4b1   : > { %v3093_v52 = vpop.eup %3092  ;;  %2230 = vst.msk [vmem:[%s3840_s13 + $0xd0] sm:$0xff] %vm1851_vm4, %v2193_v21 }
 0x4b2   : > { %v3095_v63 = vpop.eup %3094  ;;  %v2199_v56 = vmul.f32 %v3093_v52, %v3819_v1 }
 0x4b3   : > { %v2197_v58 = vmul.f32 %v3095_v63, %v3821_v4 }
 0x4b4   : > { %2233 = vst.msk [vmem:[%s3840_s13 + $0xe8] sm:$0xff] %vm1851_vm4, %v2199_v56 }
 0x4b5   : > { %v3097_v59 = vpop.eup %3096  ;;  %2232 = vst.msk [vmem:[%s3840_s13 + $0xe0] sm:$0xff] %vm1851_vm4, %v2197_v58 }
 0x4b6   : > { %v3099_v22 = vpop.eup %3098  ;;  %v2203_v62 = vmul.f32 %v3097_v59, %v3827_v35 }
 0x4b7   : > { %v2201_v2 = vmul.f32 %v3099_v22, %v3829_v14 }
 0x4b8   : > { %2235 = vst.msk [vmem:[%s3840_s13 + $0xf8] sm:$0xff] %vm1851_vm4, %v2203_v62 }
 0x4b9   : > { %2234 = vst.msk [vmem:[%s3840_s13 + $0xf0] sm:$0xff] %vm1851_vm4, %v2201_v2 }
 0x4ba PF: > { %s18_s27 = sadd.s32 1, %s3106_s27  }
 0x4bb   : > { %p15_p4 = scmp.ge.s32.totalorder %s18_s27, 4  }
 0x4bd   :  { %17 = sbr.rel (!%p15_p4) target bundleno = 1 (0x1), region = 82 }

</bundles_post_ra>
